<compile_context>
chip_gen: v7x
topology: tpu7x:2x2x1
jax: 0.10.0
libtpu: 0.0.40
codegen_flags: <defaults>
</compile_context>

<pallas_src>
import functools

import numpy as np

import jax
import jax.numpy as jnp
from jax.experimental import pallas as pl
from jax.experimental.pallas import tpu as pltpu

TCHUNK_MAX = 32       # max timesteps statically unrolled per sequential grid step
LANE = 128            # lane width  (last-dim alignment)
SUBLANE = 8           # sublane width (second-to-last-dim alignment)
VMEM_LIMIT = 48 * 1024 * 1024   # scoped VMEM budget for the parallel matmuls


def _round_up(x, m):
    return (x + m - 1) // m * m


def _pick_tile(n, candidates):
    for c in candidates:
        if c <= n and n % c == 0:
            return c
    return n


def _num_recurrence_splits(batch_p):
    """2 on v7x (two TensorCores) when the padded batch allows it, else 1."""
    try:
        kind = jax.devices()[0].device_kind.lower()
    except Exception:
        kind = ""
    if any(tag in kind for tag in ("v7", "tpu7", "7x")) and batch_p % 16 == 0:
        return 2
    return 1


# ----------------------------------------------------------------------------
# Kernel 1: tiled  Y = X @ W + b  (bf16 operands, f32 accumulate).
# weight_resident=True makes the N (weight) axis the slowest grid axis, so each
# weight tile is DMA'd exactly once (used for the vocab projection where
# W_out >> activations).
# ----------------------------------------------------------------------------
def _matmul_bias_kernel(x_ref, w_ref, b_ref, o_ref):
    o_ref[...] = (jnp.dot(x_ref[...], w_ref[...],
                          preferred_element_type=jnp.float32)
                  + b_ref[...]).astype(o_ref.dtype)


def matmul_bias(x, w, b, *, out_dtype=jnp.float32, tm_max=512, tn_max=1024,
                weight_resident=False):
    """x: (M, K), w: (K, N), b: (1, N) -> (M, N)."""
    M, K = x.shape
    _, N = w.shape
    tm = _pick_tile(M, (tm_max, 256, 128, 64, 32, 16, 8))
    tn = _pick_tile(N, (tn_max, 512, 256, 128))

    blk_bytes = 2 * (tm * K * x.dtype.itemsize
                     + K * tn * w.dtype.itemsize
                     + tm * tn * jnp.dtype(out_dtype).itemsize
                     + tn * b.dtype.itemsize)
    assert blk_bytes <= VMEM_LIMIT, (
        f"matmul_bias tiles (tm={tm}, tn={tn}, K={K}) exceed VMEM budget "
        f"({blk_bytes} > {VMEM_LIMIT}); add a K grid axis / shrink tiles.")

    if weight_resident:
        grid = (N // tn, M // tm)           # N outermost -> W tile stays resident
        x_map = lambda j, i: (i, 0)
        w_map = lambda j, i: (0, j)
        b_map = lambda j, i: (0, j)
        o_map = lambda j, i: (i, j)
    else:
        grid = (M // tm, N // tn)
        x_map = lambda i, j: (i, 0)
        w_map = lambda i, j: (0, j)
        b_map = lambda i, j: (0, j)
        o_map = lambda i, j: (i, j)

    return pl.pallas_call(
        _matmul_bias_kernel,
        out_shape=jax.ShapeDtypeStruct((M, N), out_dtype),
        grid=grid,
        in_specs=[
            pl.BlockSpec((tm, K), x_map),
            pl.BlockSpec((K, tn), w_map),
            pl.BlockSpec((1, tn), b_map),
        ],
        out_specs=pl.BlockSpec((tm, tn), o_map),
        compiler_params=pltpu.CompilerParams(
            dimension_semantics=("parallel", "parallel"),
            vmem_limit_bytes=VMEM_LIMIT),
    )(x, w, b)


# ----------------------------------------------------------------------------
# Kernel 2: LSTM recurrence.  gates_x already holds x_t @ W_ih^T + (b_ih+b_hh)
# (bf16); only h_prev @ W_hh^T + gate elementwise is on the serial path.
# Grid: (batch_splits [parallel], time_chunks [arbitrary, sequential]).
# ----------------------------------------------------------------------------
def _lstm_recurrence_kernel(gx_ref, h0_ref, c0_ref, w_hh_ref,
                            y_ref, hn_ref, cn_ref,
                            h_scr, c_scr, *, hidden_p, seq_len, tchunk):
    ct = pl.program_id(1)
    Hp = hidden_p

    @pl.when(ct == 0)
    def _():
        h_scr[...] = h0_ref[...]
        c_scr[...] = c0_ref[...]

    def run_chunk(masked):
        h = h_scr[...]
        c = c_scr[...]
        for s in range(tchunk):                       # static unroll
            gates = (gx_ref[s].astype(jnp.float32)
                     + jnp.dot(h.astype(jnp.bfloat16), w_hh_ref[...],
                               preferred_element_type=jnp.float32))
            # sigmoid(x) = 0.5*tanh(0.5*x)+0.5 : single EUP push per gate
            i_g = 0.5 * jnp.tanh(0.5 * gates[:, 0 * Hp:1 * Hp]) + 0.5
            f_g = 0.5 * jnp.tanh(0.5 * gates[:, 1 * Hp:2 * Hp]) + 0.5
            g_g = jnp.tanh(gates[:, 2 * Hp:3 * Hp])
            o_g = 0.5 * jnp.tanh(0.5 * gates[:, 3 * Hp:4 * Hp]) + 0.5

            c_new = f_g * c + i_g * g_g
            h_new = o_g * jnp.tanh(c_new)

            if masked:                                # freeze carries past true T
                valid = (ct * tchunk + s) < seq_len
                h = jnp.where(valid, h_new, h)
                c = jnp.where(valid, c_new, c)
            else:
                h, c = h_new, c_new

            y_ref[s] = h_new.astype(y_ref.dtype)      # rows past T sliced off later
        h_scr[...] = h
        c_scr[...] = c

    needs_mask = (seq_len % tchunk) != 0              # static
    if needs_mask:
        is_full = (ct + 1) * tchunk <= seq_len        # only the last chunk masks

        @pl.when(is_full)
        def _():
            run_chunk(False)

        @pl.when(jnp.logical_not(is_full))
        def _():
            run_chunk(True)
    else:
        run_chunk(False)

    @pl.when(ct == pl.num_programs(1) - 1)
    def _():
        hn_ref[...] = h_scr[...].astype(hn_ref.dtype)
        cn_ref[...] = c_scr[...].astype(cn_ref.dtype)


def lstm_layer(gates_x, h0, c0, w_hh_t, *, seq_len, tchunk):
    """gates_x: (Tp, Bp, 4Hp) bf16 time-major. Returns (y bf16, h_n f32, c_n f32)."""
    Tp, Bp, H4 = gates_x.shape
    Hp = H4 // 4
    nb = _num_recurrence_splits(Bp)       # 2 on v7x (two TCs), else 1
    tb = Bp // nb
    nct = Tp // tchunk

    kernel = functools.partial(_lstm_recurrence_kernel, hidden_p=Hp,
                               seq_len=seq_len, tchunk=tchunk)
    return pl.pallas_call(
        kernel,
        out_shape=(
            jax.ShapeDtypeStruct((Tp, Bp, Hp), jnp.bfloat16),  # per-step hidden
            jax.ShapeDtypeStruct((Bp, Hp), jnp.float32),       # h_n
            jax.ShapeDtypeStruct((Bp, Hp), jnp.float32),       # c_n
        ),
        grid=(nb, nct),
        in_specs=[
            pl.BlockSpec((tchunk, tb, 4 * Hp), lambda b, t: (t, b, 0)),
            pl.BlockSpec((tb, Hp), lambda b, t: (b, 0)),
            pl.BlockSpec((tb, Hp), lambda b, t: (b, 0)),
            # constant block over t; see TODO(synk) about single-buffering.
            pl.BlockSpec((Hp, 4 * Hp), lambda b, t: (0, 0)),
        ],
        out_specs=(
            pl.BlockSpec((tchunk, tb, Hp), lambda b, t: (t, b, 0)),
            pl.BlockSpec((tb, Hp), lambda b, t: (b, 0)),
            pl.BlockSpec((tb, Hp), lambda b, t: (b, 0)),
        ),
        scratch_shapes=[
            pltpu.VMEM((tb, Hp), jnp.float32),   # h carry
            pltpu.VMEM((tb, Hp), jnp.float32),   # c carry
        ],
        compiler_params=pltpu.CompilerParams(
            dimension_semantics=("parallel", "arbitrary")),
    )(gates_x, h0, c0, w_hh_t)


# ----------------------------------------------------------------------------
# Parameter prep: PyTorch-convention weights -> transposed, vreg-padded,
# per-gate-padded, bf16-stored kernel weights (biases stay f32).
# ----------------------------------------------------------------------------
def prepare_params(raw, *, hidden, vocab):
    Hp = _round_up(hidden, LANE)
    Vp = _round_up(vocab, LANE)

    def pad_gates(w):                       # w: (4H, H) -> (Hp, 4Hp) bf16
        w_t = jnp.pad(w.T, ((0, Hp - hidden), (0, 0)))        # (Hp, 4H)
        w4 = w_t.reshape(Hp, 4, hidden)
        w4 = jnp.pad(w4, ((0, 0), (0, 0), (0, Hp - hidden)))  # per-gate pad
        return w4.reshape(Hp, 4 * Hp).astype(jnp.bfloat16)

    def pad_bias(b_ih, b_hh):               # combined bias, per-gate padded, f32
        bb = (b_ih + b_hh).reshape(4, hidden)
        bb = jnp.pad(bb, ((0, 0), (0, Hp - hidden)))
        return bb.reshape(1, 4 * Hp)

    layers = [{
        "w_ih_t": pad_gates(lw["w_ih"]),
        "w_hh_t": pad_gates(lw["w_hh"]),
        "b": pad_bias(lw["b_ih"], lw["b_hh"]),
    } for lw in raw["layers"]]

    return {
        "embedding": jnp.pad(raw["embedding"],
                             ((0, 0), (0, Hp - hidden))).astype(jnp.bfloat16),
        "layers": layers,
        "w_out_t": jnp.pad(raw["w_out"].T,
                           ((0, Hp - hidden), (0, Vp - vocab))).astype(jnp.bfloat16),
        "b_out": jnp.pad(raw["b_out"], (0, Vp - vocab)).reshape(1, Vp),
    }


# ----------------------------------------------------------------------------
# Full model forward (matches LSTMLM.forward: out, h_n, c_n)
# ----------------------------------------------------------------------------
def lstm_lm_forward(params, x_tokens, h0, c0):
    """x_tokens: (B, T) int32; h0, c0: (L, B, H). Returns (out (B,T,V), h_n, c_n)."""
    B, T = x_tokens.shape
    L, _, H = h0.shape
    Hp = params["w_out_t"].shape[0]
    V = params["embedding"].shape[0]                  # logical vocab size
    Bp = _round_up(B, SUBLANE)
    tchunk = min(TCHUNK_MAX, _round_up(T, SUBLANE))
    Tp = _round_up(T, tchunk)

    # Embedding gather (plain-JAX glue), produced directly TIME-MAJOR (bf16).
    # Padding tokens use padding_idx=1 whose embedding row is zero.
    x_pad = jnp.full((Bp, Tp), 1, dtype=x_tokens.dtype)
    x_pad = x_pad.at[:B, :T].set(x_tokens)
    layer_in = params["embedding"][x_pad.T]           # (Tp, Bp, Hp) bf16

    h0p = jnp.pad(h0, ((0, 0), (0, Bp - B), (0, Hp - H)))
    c0p = jnp.pad(c0, ((0, 0), (0, Bp - B), (0, Hp - H)))

    h_n, c_n = [], []
    for l, lp in enumerate(params["layers"]):
        # Hoisted input projection: one big bf16 MXU matmul over all timesteps,
        # emitting the 4H-wide gates stream in bf16.
        gates_x = matmul_bias(layer_in.reshape(Tp * Bp, Hp),
                              lp["w_ih_t"], lp["b"],
                              out_dtype=jnp.bfloat16).reshape(Tp, Bp, 4 * Hp)
        y, hn, cn = lstm_layer(gates_x, h0p[l], c0p[l], lp["w_hh_t"],
                               seq_len=T, tchunk=tchunk)
        h_n.append(hn)
        c_n.append(cn)
        layer_in = y
        # TODO(synk): inter-layer dropout skipped (identity in eval mode).

    # Small H-wide transpose so the projection emits batch-first (B,T,V)
    # directly (no transpose of the V-wide logits tensor).
    h_bt = jnp.transpose(layer_in, (1, 0, 2))          # (Bp, Tp, Hp) bf16
    logits = matmul_bias(h_bt.reshape(Bp * Tp, Hp), params["w_out_t"],
                         params["b_out"], out_dtype=jnp.float32,
                         weight_resident=True).reshape(Bp, Tp, -1)

    out = logits[:B, :T, :V]
    h_n = jnp.stack(h_n)[:, :B, :H]
    c_n = jnp.stack(c_n)[:, :B, :H]
    return out, h_n, c_n


# ----------------------------------------------------------------------------
# Deterministic PyTorch-convention parameter init + pure-JAX reference
# ----------------------------------------------------------------------------
def init_raw_params(key, vocab_size, hidden, num_layers):
    ks = jax.random.split(key, 3 + 4 * num_layers)
    scale = 1.0 / float(np.sqrt(hidden))

    emb = jax.random.normal(ks[0], (vocab_size, hidden), jnp.float32)
    emb = emb.at[1].set(0.0)                              # padding_idx = 1

    layers = []
    for l in range(num_layers):
        k0, k1, k2, k3 = ks[3 + 4 * l: 7 + 4 * l]
        layers.append({
            "w_ih": jax.random.uniform(k0, (4 * hidden, hidden), jnp.float32, -scale, scale),
            "w_hh": jax.random.uniform(k1, (4 * hidden, hidden), jnp.float32, -scale, scale),
            "b_ih": jax.random.uniform(k2, (4 * hidden,), jnp.float32, -scale, scale),
            "b_hh": jax.random.uniform(k3, (4 * hidden,), jnp.float32, -scale, scale),
        })

    w_out = jax.random.uniform(ks[1], (vocab_size, hidden), jnp.float32, -scale, scale)
    b_out = jax.random.uniform(ks[2], (vocab_size,), jnp.float32, -scale, scale)
    return {"embedding": emb, "layers": layers, "w_out": w_out, "b_out": b_out}


def quantize_weights_like_kernel(raw):
    """Reference weights run through the same bf16 storage quantization."""
    def q(a):
        return a.astype(jnp.bfloat16).astype(jnp.float32)
    return {
        "embedding": q(raw["embedding"]),
        "layers": [{"w_ih": q(l["w_ih"]), "w_hh": q(l["w_hh"]),
                    "b_ih": l["b_ih"], "b_hh": l["b_hh"]} for l in raw["layers"]],
        "w_out": q(raw["w_out"]),
        "b_out": raw["b_out"],
    }


def lstm_lm_reference(raw, x, h0, c0):
    xs = jnp.transpose(raw["embedding"][x], (1, 0, 2))    # (T, B, H)
    h_n, c_n = [], []
    for l, lw in enumerate(raw["layers"]):
        def step(carry, x_t, lw=lw):
            h, c = carry
            g = x_t @ lw["w_ih"].T + h @ lw["w_hh"].T + lw["b_ih"] + lw["b_hh"]
            i, f, gg, o = jnp.split(g, 4, axis=-1)
            c = jax.nn.sigmoid(f) * c + jax.nn.sigmoid(i) * jnp.tanh(gg)
            h = jax.nn.sigmoid(o) * jnp.tanh(c)
            return (h, c), h
        (hT, cT), xs = jax.lax.scan(step, (h0[l], c0[l]), xs)
        h_n.append(hT)
        c_n.append(cT)
    out = jnp.einsum("tbh,vh->btv", xs, raw["w_out"]) + raw["b_out"]
    return out, jnp.stack(h_n), jnp.stack(c_n)


if __name__ == "__main__":
    VOCAB, HIDDEN, LAYERS, BATCH, SEQ = 64, 32, 2, 2, 8

    root = jax.random.PRNGKey(0)
    k_param, k_x, k_h, k_c = jax.random.split(root, 4)

    raw = init_raw_params(k_param, VOCAB, HIDDEN, LAYERS)
    params = prepare_params(raw, hidden=HIDDEN, vocab=VOCAB)

    x = jax.random.randint(k_x, (BATCH, SEQ), 0, VOCAB, dtype=jnp.int32)
    h0 = jax.random.normal(k_h, (LAYERS, BATCH, HIDDEN), jnp.float32)
    c0 = jax.random.normal(k_c, (LAYERS, BATCH, HIDDEN), jnp.float32)

    out, h_n, c_n = jax.jit(lstm_lm_forward)(params, x, h0, c0)
    jax.block_until_ready((out, h_n, c_n))

    assert out.shape == (BATCH, SEQ, VOCAB)
    assert h_n.shape == (LAYERS, BATCH, HIDDEN)
    assert c_n.shape == (LAYERS, BATCH, HIDDEN)

    # Correctness check against a pure-JAX reference using the same bf16
    # weight quantization (activation streams in the kernel are bf16, so use
    # a moderately loose tolerance).
    raw_q = quantize_weights_like_kernel(raw)
    out_r, h_r, c_r = lstm_lm_reference(raw_q, x, h0, c0)
    np.testing.assert_allclose(np.asarray(out), np.asarray(out_r), rtol=3e-2, atol=3e-2)
    np.testing.assert_allclose(np.asarray(h_n), np.asarray(h_r), rtol=3e-2, atol=3e-2)
    np.testing.assert_allclose(np.asarray(c_n), np.asarray(c_r), rtol=3e-2, atol=3e-2)

    print("KERNEL_OK")
</pallas_src>

<mosaic_0001>
module attributes {stable_mosaic.version = 11 : i64} {
  func.func @_matmul_bias_kernel(%arg0: i32, %arg1: i32, %arg2: memref<64x128xbf16, #tpu.memory_space<vmem>>, %arg3: memref<128x128xbf16, #tpu.memory_space<vmem>>, %arg4: memref<1x128xf32, #tpu.memory_space<vmem>>, %arg5: memref<64x128xf32, #tpu.memory_space<vmem>>) attributes {dimension_semantics = [#tpu.dimension_semantics<parallel>, #tpu.dimension_semantics<parallel>], iteration_bounds = array<i64: 1, 1>, scalar_prefetch = 0 : i64, scratch_operands = 0 : i64, tpu.core_type = #tpu.core_type<tc>, window_params = [{transform_indices = @transform_0, window_bounds = array<i64: 64, 128>}, {transform_indices = @transform_1, window_bounds = array<i64: 128, 128>}, {transform_indices = @transform_2, window_bounds = array<i64: 1, 128>}, {transform_indices = @transform_3, window_bounds = array<i64: 64, 128>}]} {
    %c0 = arith.constant 0 : index
    %c0_0 = arith.constant 0 : index
    %0 = vector.load %arg2[%c0, %c0_0] : memref<64x128xbf16, #tpu.memory_space<vmem>>, vector<64x128xbf16>
    %c0_1 = arith.constant 0 : index
    %c0_2 = arith.constant 0 : index
    %1 = vector.load %arg3[%c0_1, %c0_2] : memref<128x128xbf16, #tpu.memory_space<vmem>>, vector<128x128xbf16>
    %cst = arith.constant dense<0.000000e+00> : vector<64x128xf32>
    %2 = tpu.matmul %0, %1, %cst {dimension_numbers = #tpu.dot_dimension_numbers<[1], [0], [0], [1], [0, 0, 1, 1], [], []>} : vector<64x128xbf16>, vector<128x128xbf16>, vector<64x128xf32> -> vector<64x128xf32>
    %c0_3 = arith.constant 0 : index
    %c0_4 = arith.constant 0 : index
    %3 = vector.load %arg4[%c0_3, %c0_4] : memref<1x128xf32, #tpu.memory_space<vmem>>, vector<1x128xf32>
    %4 = vector.broadcast %3 : vector<1x128xf32> to vector<64x128xf32>
    %5 = arith.addf %2, %4 : vector<64x128xf32>
    %c0_5 = arith.constant 0 : index
    %c0_6 = arith.constant 0 : index
    %6 = vector.load %arg5[%c0_5, %c0_6] : memref<64x128xf32, #tpu.memory_space<vmem>>, vector<64x128xf32>
    tpu.vector_store %arg5[%c0_5, %c0_6], %5 {strides = array<i32>} : memref<64x128xf32, #tpu.memory_space<vmem>>, vector<64x128xf32>,
    return
  }
  func.func @transform_0(%arg0: i32, %arg1: i32) -> (i32, i32) {
    %c0_i32 = arith.constant 0 : i32
    %c0_i32_0 = arith.constant 0 : i32
    return %arg1, %c0_i32 : i32, i32
  }
  func.func @transform_1(%arg0: i32, %arg1: i32) -> (i32, i32) {
    %c0_i32 = arith.constant 0 : i32
    %c0_i32_0 = arith.constant 0 : i32
    return %c0_i32, %arg0 : i32, i32
  }
  func.func @transform_2(%arg0: i32, %arg1: i32) -> (i32, i32) {
    %c0_i32 = arith.constant 0 : i32
    %c0_i32_0 = arith.constant 0 : i32
    return %c0_i32, %arg0 : i32, i32
  }
  func.func @transform_3(%arg0: i32, %arg1: i32) -> (i32, i32) {
    %c0_i32 = arith.constant 0 : i32
    return %arg1, %arg0 : i32, i32
  }
}

module attributes {stable_mosaic.version = 11 : i64} {
  func.func @_matmul_bias_kernel(%arg0: i32, %arg1: i32, %arg2: memref<64x128xbf16, #tpu.memory_space<vmem>>, %arg3: memref<128x512xbf16, #tpu.memory_space<vmem>>, %arg4: memref<1x512xf32, #tpu.memory_space<vmem>>, %arg5: memref<64x512xbf16, #tpu.memory_space<vmem>>) attributes {dimension_semantics = [#tpu.dimension_semantics<parallel>, #tpu.dimension_semantics<parallel>], iteration_bounds = array<i64: 1, 1>, scalar_prefetch = 0 : i64, scratch_operands = 0 : i64, tpu.core_type = #tpu.core_type<tc>, window_params = [{transform_indices = @transform_0, window_bounds = array<i64: 64, 128>}, {transform_indices = @transform_1, window_bounds = array<i64: 128, 512>}, {transform_indices = @transform_2, window_bounds = array<i64: 1, 512>}, {transform_indices = @transform_3, window_bounds = array<i64: 64, 512>}]} {
    %c0 = arith.constant 0 : index
    %c0_0 = arith.constant 0 : index
    %0 = vector.load %arg2[%c0, %c0_0] : memref<64x128xbf16, #tpu.memory_space<vmem>>, vector<64x128xbf16>
    %c0_1 = arith.constant 0 : index
    %c0_2 = arith.constant 0 : index
    %1 = vector.load %arg3[%c0_1, %c0_2] : memref<128x512xbf16, #tpu.memory_space<vmem>>, vector<128x512xbf16>
    %cst = arith.constant dense<0.000000e+00> : vector<64x512xf32>
    %2 = tpu.matmul %0, %1, %cst {dimension_numbers = #tpu.dot_dimension_numbers<[1], [0], [0], [1], [0, 0, 1, 1], [], []>} : vector<64x128xbf16>, vector<128x512xbf16>, vector<64x512xf32> -> vector<64x512xf32>
    %c0_3 = arith.constant 0 : index
    %c0_4 = arith.constant 0 : index
    %3 = vector.load %arg4[%c0_3, %c0_4] : memref<1x512xf32, #tpu.memory_space<vmem>>, vector<1x512xf32>
    %4 = vector.broadcast %3 : vector<1x512xf32> to vector<64x512xf32>
    %5 = arith.addf %2, %4 : vector<64x512xf32>
    %6 = arith.truncf %5 : vector<64x512xf32> to vector<64x512xbf16>
    %c0_5 = arith.constant 0 : index
    %c0_6 = arith.constant 0 : index
    %7 = vector.load %arg5[%c0_5, %c0_6] : memref<64x512xbf16, #tpu.memory_space<vmem>>, vector<64x512xbf16>
    tpu.vector_store %arg5[%c0_5, %c0_6], %6 {strides = array<i32>} : memref<64x512xbf16, #tpu.memory_space<vmem>>, vector<64x512xbf16>,
    return
  }
  func.func @transform_0(%arg0: i32, %arg1: i32) -> (i32, i32) {
    %c0_i32 = arith.constant 0 : i32
    %c0_i32_0 = arith.constant 0 : i32
    return %arg0, %c0_i32 : i32, i32
  }
  func.func @transform_1(%arg0: i32, %arg1: i32) -> (i32, i32) {
    %c0_i32 = arith.constant 0 : i32
    %c0_i32_0 = arith.constant 0 : i32
    return %c0_i32, %arg1 : i32, i32
  }
  func.func @transform_2(%arg0: i32, %arg1: i32) -> (i32, i32) {
    %c0_i32 = arith.constant 0 : i32
    %c0_i32_0 = arith.constant 0 : i32
    return %c0_i32, %arg1 : i32, i32
  }
  func.func @transform_3(%arg0: i32, %arg1: i32) -> (i32, i32) {
    %c0_i32 = arith.constant 0 : i32
    return %arg0, %arg1 : i32, i32
  }
}

module attributes {stable_mosaic.version = 11 : i64} {
  func.func @_lstm_recurrence_kernel(%arg0: i32, %arg1: i32, %arg2: memref<8x8x512xbf16, #tpu.memory_space<vmem>>, %arg3: memref<8x128xf32, #tpu.memory_space<vmem>>, %arg4: memref<8x128xf32, #tpu.memory_space<vmem>>, %arg5: memref<128x512xbf16, #tpu.memory_space<vmem>>, %arg6: memref<8x8x128xbf16, #tpu.memory_space<vmem>>, %arg7: memref<8x128xf32, #tpu.memory_space<vmem>>, %arg8: memref<8x128xf32, #tpu.memory_space<vmem>>, %arg9: memref<8x128xf32, #tpu.memory_space<vmem>>, %arg10: memref<8x128xf32, #tpu.memory_space<vmem>>) attributes {dimension_semantics = [#tpu.dimension_semantics<parallel>, #tpu.dimension_semantics<arbitrary>], iteration_bounds = array<i64: 1, 1>, scalar_prefetch = 0 : i64, scratch_operands = 2 : i64, tpu.core_type = #tpu.core_type<tc>, window_params = [{transform_indices = @transform_0, window_bounds = array<i64: 8, 8, 512>}, {transform_indices = @transform_1, window_bounds = array<i64: 8, 128>}, {transform_indices = @transform_2, window_bounds = array<i64: 8, 128>}, {pipeline_mode = #tpu.pipeline_mode<synchronous>, transform_indices = @transform_3, window_bounds = array<i64: 128, 512>}, {transform_indices = @transform_4, window_bounds = array<i64: 8, 8, 128>}, {transform_indices = @transform_5, window_bounds = array<i64: 8, 128>}, {transform_indices = @transform_6, window_bounds = array<i64: 8, 128>}]} {
    %c0_i32 = arith.constant 0 : i32
    %0 = arith.cmpi eq, %arg1, %c0_i32 : i32
    %1 = arith.extui %0 : i1 to i32
    %c0_i32_0 = arith.constant 0 : i32
    %2 = arith.cmpi ne, %1, %c0_i32_0 : i32
    scf.if %2 {
      %c0_146 = arith.constant 0 : index
      %c0_147 = arith.constant 0 : index
      %346 = vector.load %arg3[%c0_146, %c0_147] : memref<8x128xf32, #tpu.memory_space<vmem>>, vector<8x128xf32>
      %c0_148 = arith.constant 0 : index
      %c0_149 = arith.constant 0 : index
      %347 = vector.load %arg9[%c0_148, %c0_149] : memref<8x128xf32, #tpu.memory_space<vmem>>, vector<8x128xf32>
      tpu.vector_store %arg9[%c0_148, %c0_149], %346 {strides = array<i32>} : memref<8x128xf32, #tpu.memory_space<vmem>>, vector<8x128xf32>,
      %c0_150 = arith.constant 0 : index
      %c0_151 = arith.constant 0 : index
      %348 = vector.load %arg4[%c0_150, %c0_151] : memref<8x128xf32, #tpu.memory_space<vmem>>, vector<8x128xf32>
      %c0_152 = arith.constant 0 : index
      %c0_153 = arith.constant 0 : index
      %349 = vector.load %arg10[%c0_152, %c0_153] : memref<8x128xf32, #tpu.memory_space<vmem>>, vector<8x128xf32>
      tpu.vector_store %arg10[%c0_152, %c0_153], %348 {strides = array<i32>} : memref<8x128xf32, #tpu.memory_space<vmem>>, vector<8x128xf32>,
    } else {
    }
    %c0 = arith.constant 0 : index
    %c0_1 = arith.constant 0 : index
    %3 = vector.load %arg9[%c0, %c0_1] : memref<8x128xf32, #tpu.memory_space<vmem>>, vector<8x128xf32>
    %c0_2 = arith.constant 0 : index
    %c0_3 = arith.constant 0 : index
    %4 = vector.load %arg10[%c0_2, %c0_3] : memref<8x128xf32, #tpu.memory_space<vmem>>, vector<8x128xf32>
    %c0_4 = arith.constant 0 : index
    %c0_5 = arith.constant 0 : index
    %c0_6 = arith.constant 0 : index
    %5 = vector.load %arg2[%c0_4, %c0_5, %c0_6] : memref<8x8x512xbf16, #tpu.memory_space<vmem>>, vector<1x8x512xbf16>
    %6 = vector.shape_cast %5 : vector<1x8x512xbf16> to vector<8x512xbf16>
    %7 = arith.extf %6 : vector<8x512xbf16> to vector<8x512xf32>
    %8 = arith.truncf %3 : vector<8x128xf32> to vector<8x128xbf16>
    %c0_7 = arith.constant 0 : index
    %c0_8 = arith.constant 0 : index
    %9 = vector.load %arg5[%c0_7, %c0_8] : memref<128x512xbf16, #tpu.memory_space<vmem>>, vector<128x512xbf16>
    %cst = arith.constant dense<0.000000e+00> : vector<8x512xf32>
    %10 = tpu.matmul %8, %9, %cst {dimension_numbers = #tpu.dot_dimension_numbers<[1], [0], [0], [1], [0, 0, 1, 1], [], []>} : vector<8x128xbf16>, vector<128x512xbf16>, vector<8x512xf32> -> vector<8x512xf32>
    %11 = arith.addf %7, %10 : vector<8x512xf32>
    %12 = vector.extract_strided_slice %11 {offsets = [0, 0], sizes = [8, 128], strides = [1, 1]} : vector<8x512xf32> to vector<8x128xf32>
    %cst_9 = arith.constant 5.000000e-01 : f32
    %13 = vector.broadcast %cst_9 : f32 to vector<8x128xf32>
    %14 = arith.mulf %13, %12 : vector<8x128xf32>
    %15 = math.tanh %14 : vector<8x128xf32>
    %cst_10 = arith.constant 5.000000e-01 : f32
    %16 = vector.broadcast %cst_10 : f32 to vector<8x128xf32>
    %17 = arith.mulf %16, %15 : vector<8x128xf32>
    %cst_11 = arith.constant 5.000000e-01 : f32
    %18 = vector.broadcast %cst_11 : f32 to vector<8x128xf32>
    %19 = arith.addf %17, %18 : vector<8x128xf32>
    %20 = vector.extract_strided_slice %11 {offsets = [0, 128], sizes = [8, 128], strides = [1, 1]} : vector<8x512xf32> to vector<8x128xf32>
    %cst_12 = arith.constant 5.000000e-01 : f32
    %21 = vector.broadcast %cst_12 : f32 to vector<8x128xf32>
    %22 = arith.mulf %21, %20 : vector<8x128xf32>
    %23 = math.tanh %22 : vector<8x128xf32>
    %cst_13 = arith.constant 5.000000e-01 : f32
    %24 = vector.broadcast %cst_13 : f32 to vector<8x128xf32>
    %25 = arith.mulf %24, %23 : vector<8x128xf32>
    %cst_14 = arith.constant 5.000000e-01 : f32
    %26 = vector.broadcast %cst_14 : f32 to vector<8x128xf32>
    %27 = arith.addf %25, %26 : vector<8x128xf32>
    %28 = vector.extract_strided_slice %11 {offsets = [0, 256], sizes = [8, 128], strides = [1, 1]} : vector<8x512xf32> to vector<8x128xf32>
    %29 = math.tanh %28 : vector<8x128xf32>
    %30 = vector.extract_strided_slice %11 {offsets = [0, 384], sizes = [8, 128], strides = [1, 1]} : vector<8x512xf32> to vector<8x128xf32>
    %cst_15 = arith.constant 5.000000e-01 : f32
    %31 = vector.broadcast %cst_15 : f32 to vector<8x128xf32>
    %32 = arith.mulf %31, %30 : vector<8x128xf32>
    %33 = math.tanh %32 : vector<8x128xf32>
    %cst_16 = arith.constant 5.000000e-01 : f32
    %34 = vector.broadcast %cst_16 : f32 to vector<8x128xf32>
    %35 = arith.mulf %34, %33 : vector<8x128xf32>
    %cst_17 = arith.constant 5.000000e-01 : f32
    %36 = vector.broadcast %cst_17 : f32 to vector<8x128xf32>
    %37 = arith.addf %35, %36 : vector<8x128xf32>
    %38 = arith.mulf %27, %4 : vector<8x128xf32>
    %39 = arith.mulf %19, %29 : vector<8x128xf32>
    %40 = arith.addf %38, %39 : vector<8x128xf32>
    %41 = math.tanh %40 : vector<8x128xf32>
    %42 = arith.mulf %37, %41 : vector<8x128xf32>
    %43 = arith.truncf %42 : vector<8x128xf32> to vector<8x128xbf16>
    %c0_18 = arith.constant 0 : index
    %c0_19 = arith.constant 0 : index
    %c0_20 = arith.constant 0 : index
    %44 = vector.load %arg6[%c0_18, %c0_19, %c0_20] : memref<8x8x128xbf16, #tpu.memory_space<vmem>>, vector<1x8x128xbf16>
    %45 = vector.shape_cast %44 : vector<1x8x128xbf16> to vector<8x128xbf16>
    %46 = vector.shape_cast %43 : vector<8x128xbf16> to vector<1x8x128xbf16>
    tpu.vector_store %arg6[%c0_18, %c0_19, %c0_20], %46 {strides = array<i32>} : memref<8x8x128xbf16, #tpu.memory_space<vmem>>, vector<1x8x128xbf16>,
    %c1 = arith.constant 1 : index
    %c0_21 = arith.constant 0 : index
    %c0_22 = arith.constant 0 : index
    %47 = vector.load %arg2[%c1, %c0_21, %c0_22] : memref<8x8x512xbf16, #tpu.memory_space<vmem>>, vector<1x8x512xbf16>
    %48 = vector.shape_cast %47 : vector<1x8x512xbf16> to vector<8x512xbf16>
    %49 = arith.extf %48 : vector<8x512xbf16> to vector<8x512xf32>
    %50 = arith.truncf %42 : vector<8x128xf32> to vector<8x128xbf16>
    %c0_23 = arith.constant 0 : index
    %c0_24 = arith.constant 0 : index
    %51 = vector.load %arg5[%c0_23, %c0_24] : memref<128x512xbf16, #tpu.memory_space<vmem>>, vector<128x512xbf16>
    %cst_25 = arith.constant dense<0.000000e+00> : vector<8x512xf32>
    %52 = tpu.matmul %50, %51, %cst_25 {dimension_numbers = #tpu.dot_dimension_numbers<[1], [0], [0], [1], [0, 0, 1, 1], [], []>} : vector<8x128xbf16>, vector<128x512xbf16>, vector<8x512xf32> -> vector<8x512xf32>
    %53 = arith.addf %49, %52 : vector<8x512xf32>
    %54 = vector.extract_strided_slice %53 {offsets = [0, 0], sizes = [8, 128], strides = [1, 1]} : vector<8x512xf32> to vector<8x128xf32>
    %cst_26 = arith.constant 5.000000e-01 : f32
    %55 = vector.broadcast %cst_26 : f32 to vector<8x128xf32>
    %56 = arith.mulf %55, %54 : vector<8x128xf32>
    %57 = math.tanh %56 : vector<8x128xf32>
    %cst_27 = arith.constant 5.000000e-01 : f32
    %58 = vector.broadcast %cst_27 : f32 to vector<8x128xf32>
    %59 = arith.mulf %58, %57 : vector<8x128xf32>
    %cst_28 = arith.constant 5.000000e-01 : f32
    %60 = vector.broadcast %cst_28 : f32 to vector<8x128xf32>
    %61 = arith.addf %59, %60 : vector<8x128xf32>
    %62 = vector.extract_strided_slice %53 {offsets = [0, 128], sizes = [8, 128], strides = [1, 1]} : vector<8x512xf32> to vector<8x128xf32>
    %cst_29 = arith.constant 5.000000e-01 : f32
    %63 = vector.broadcast %cst_29 : f32 to vector<8x128xf32>
    %64 = arith.mulf %63, %62 : vector<8x128xf32>
    %65 = math.tanh %64 : vector<8x128xf32>
    %cst_30 = arith.constant 5.000000e-01 : f32
    %66 = vector.broadcast %cst_30 : f32 to vector<8x128xf32>
    %67 = arith.mulf %66, %65 : vector<8x128xf32>
    %cst_31 = arith.constant 5.000000e-01 : f32
    %68 = vector.broadcast %cst_31 : f32 to vector<8x128xf32>
    %69 = arith.addf %67, %68 : vector<8x128xf32>
    %70 = vector.extract_strided_slice %53 {offsets = [0, 256], sizes = [8, 128], strides = [1, 1]} : vector<8x512xf32> to vector<8x128xf32>
    %71 = math.tanh %70 : vector<8x128xf32>
    %72 = vector.extract_strided_slice %53 {offsets = [0, 384], sizes = [8, 128], strides = [1, 1]} : vector<8x512xf32> to vector<8x128xf32>
    %cst_32 = arith.constant 5.000000e-01 : f32
    %73 = vector.broadcast %cst_32 : f32 to vector<8x128xf32>
    %74 = arith.mulf %73, %72 : vector<8x128xf32>
    %75 = math.tanh %74 : vector<8x128xf32>
    %cst_33 = arith.constant 5.000000e-01 : f32
    %76 = vector.broadcast %cst_33 : f32 to vector<8x128xf32>
    %77 = arith.mulf %76, %75 : vector<8x128xf32>
    %cst_34 = arith.constant 5.000000e-01 : f32
    %78 = vector.broadcast %cst_34 : f32 to vector<8x128xf32>
    %79 = arith.addf %77, %78 : vector<8x128xf32>
    %80 = arith.mulf %69, %40 : vector<8x128xf32>
    %81 = arith.mulf %61, %71 : vector<8x128xf32>
    %82 = arith.addf %80, %81 : vector<8x128xf32>
    %83 = math.tanh %82 : vector<8x128xf32>
    %84 = arith.mulf %79, %83 : vector<8x128xf32>
    %85 = arith.truncf %84 : vector<8x128xf32> to vector<8x128xbf16>
    %c1_35 = arith.constant 1 : index
    %c0_36 = arith.constant 0 : index
    %c0_37 = arith.constant 0 : index
    %86 = vector.load %arg6[%c1_35, %c0_36, %c0_37] : memref<8x8x128xbf16, #tpu.memory_space<vmem>>, vector<1x8x128xbf16>
    %87 = vector.shape_cast %86 : vector<1x8x128xbf16> to vector<8x128xbf16>
    %88 = vector.shape_cast %85 : vector<8x128xbf16> to vector<1x8x128xbf16>
    tpu.vector_store %arg6[%c1_35, %c0_36, %c0_37], %88 {strides = array<i32>} : memref<8x8x128xbf16, #tpu.memory_space<vmem>>, vector<1x8x128xbf16>,
    %c2 = arith.constant 2 : index
    %c0_38 = arith.constant 0 : index
    %c0_39 = arith.constant 0 : index
    %89 = vector.load %arg2[%c2, %c0_38, %c0_39] : memref<8x8x512xbf16, #tpu.memory_space<vmem>>, vector<1x8x512xbf16>
    %90 = vector.shape_cast %89 : vector<1x8x512xbf16> to vector<8x512xbf16>
    %91 = arith.extf %90 : vector<8x512xbf16> to vector<8x512xf32>
    %92 = arith.truncf %84 : vector<8x128xf32> to vector<8x128xbf16>
    %c0_40 = arith.constant 0 : index
    %c0_41 = arith.constant 0 : index
    %93 = vector.load %arg5[%c0_40, %c0_41] : memref<128x512xbf16, #tpu.memory_space<vmem>>, vector<128x512xbf16>
    %cst_42 = arith.constant dense<0.000000e+00> : vector<8x512xf32>
    %94 = tpu.matmul %92, %93, %cst_42 {dimension_numbers = #tpu.dot_dimension_numbers<[1], [0], [0], [1], [0, 0, 1, 1], [], []>} : vector<8x128xbf16>, vector<128x512xbf16>, vector<8x512xf32> -> vector<8x512xf32>
    %95 = arith.addf %91, %94 : vector<8x512xf32>
    %96 = vector.extract_strided_slice %95 {offsets = [0, 0], sizes = [8, 128], strides = [1, 1]} : vector<8x512xf32> to vector<8x128xf32>
    %cst_43 = arith.constant 5.000000e-01 : f32
    %97 = vector.broadcast %cst_43 : f32 to vector<8x128xf32>
    %98 = arith.mulf %97, %96 : vector<8x128xf32>
    %99 = math.tanh %98 : vector<8x128xf32>
    %cst_44 = arith.constant 5.000000e-01 : f32
    %100 = vector.broadcast %cst_44 : f32 to vector<8x128xf32>
    %101 = arith.mulf %100, %99 : vector<8x128xf32>
    %cst_45 = arith.constant 5.000000e-01 : f32
    %102 = vector.broadcast %cst_45 : f32 to vector<8x128xf32>
    %103 = arith.addf %101, %102 : vector<8x128xf32>
    %104 = vector.extract_strided_slice %95 {offsets = [0, 128], sizes = [8, 128], strides = [1, 1]} : vector<8x512xf32> to vector<8x128xf32>
    %cst_46 = arith.constant 5.000000e-01 : f32
    %105 = vector.broadcast %cst_46 : f32 to vector<8x128xf32>
    %106 = arith.mulf %105, %104 : vector<8x128xf32>
    %107 = math.tanh %106 : vector<8x128xf32>
    %cst_47 = arith.constant 5.000000e-01 : f32
    %108 = vector.broadcast %cst_47 : f32 to vector<8x128xf32>
    %109 = arith.mulf %108, %107 : vector<8x128xf32>
    %cst_48 = arith.constant 5.000000e-01 : f32
    %110 = vector.broadcast %cst_48 : f32 to vector<8x128xf32>
    %111 = arith.addf %109, %110 : vector<8x128xf32>
    %112 = vector.extract_strided_slice %95 {offsets = [0, 256], sizes = [8, 128], strides = [1, 1]} : vector<8x512xf32> to vector<8x128xf32>
    %113 = math.tanh %112 : vector<8x128xf32>
    %114 = vector.extract_strided_slice %95 {offsets = [0, 384], sizes = [8, 128], strides = [1, 1]} : vector<8x512xf32> to vector<8x128xf32>
    %cst_49 = arith.constant 5.000000e-01 : f32
    %115 = vector.broadcast %cst_49 : f32 to vector<8x128xf32>
    %116 = arith.mulf %115, %114 : vector<8x128xf32>
    %117 = math.tanh %116 : vector<8x128xf32>
    %cst_50 = arith.constant 5.000000e-01 : f32
    %118 = vector.broadcast %cst_50 : f32 to vector<8x128xf32>
    %119 = arith.mulf %118, %117 : vector<8x128xf32>
    %cst_51 = arith.constant 5.000000e-01 : f32
    %120 = vector.broadcast %cst_51 : f32 to vector<8x128xf32>
    %121 = arith.addf %119, %120 : vector<8x128xf32>
    %122 = arith.mulf %111, %82 : vector<8x128xf32>
    %123 = arith.mulf %103, %113 : vector<8x128xf32>
    %124 = arith.addf %122, %123 : vector<8x128xf32>
    %125 = math.tanh %124 : vector<8x128xf32>
    %126 = arith.mulf %121, %125 : vector<8x128xf32>
    %127 = arith.truncf %126 : vector<8x128xf32> to vector<8x128xbf16>
    %c2_52 = arith.constant 2 : index
    %c0_53 = arith.constant 0 : index
    %c0_54 = arith.constant 0 : index
    %128 = vector.load %arg6[%c2_52, %c0_53, %c0_54] : memref<8x8x128xbf16, #tpu.memory_space<vmem>>, vector<1x8x128xbf16>
    %129 = vector.shape_cast %128 : vector<1x8x128xbf16> to vector<8x128xbf16>
    %130 = vector.shape_cast %127 : vector<8x128xbf16> to vector<1x8x128xbf16>
    tpu.vector_store %arg6[%c2_52, %c0_53, %c0_54], %130 {strides = array<i32>} : memref<8x8x128xbf16, #tpu.memory_space<vmem>>, vector<1x8x128xbf16>,
    %c3 = arith.constant 3 : index
    %c0_55 = arith.constant 0 : index
    %c0_56 = arith.constant 0 : index
    %131 = vector.load %arg2[%c3, %c0_55, %c0_56] : memref<8x8x512xbf16, #tpu.memory_space<vmem>>, vector<1x8x512xbf16>
    %132 = vector.shape_cast %131 : vector<1x8x512xbf16> to vector<8x512xbf16>
    %133 = arith.extf %132 : vector<8x512xbf16> to vector<8x512xf32>
    %134 = arith.truncf %126 : vector<8x128xf32> to vector<8x128xbf16>
    %c0_57 = arith.constant 0 : index
    %c0_58 = arith.constant 0 : index
    %135 = vector.load %arg5[%c0_57, %c0_58] : memref<128x512xbf16, #tpu.memory_space<vmem>>, vector<128x512xbf16>
    %cst_59 = arith.constant dense<0.000000e+00> : vector<8x512xf32>
    %136 = tpu.matmul %134, %135, %cst_59 {dimension_numbers = #tpu.dot_dimension_numbers<[1], [0], [0], [1], [0, 0, 1, 1], [], []>} : vector<8x128xbf16>, vector<128x512xbf16>, vector<8x512xf32> -> vector<8x512xf32>
    %137 = arith.addf %133, %136 : vector<8x512xf32>
    %138 = vector.extract_strided_slice %137 {offsets = [0, 0], sizes = [8, 128], strides = [1, 1]} : vector<8x512xf32> to vector<8x128xf32>
    %cst_60 = arith.constant 5.000000e-01 : f32
    %139 = vector.broadcast %cst_60 : f32 to vector<8x128xf32>
    %140 = arith.mulf %139, %138 : vector<8x128xf32>
    %141 = math.tanh %140 : vector<8x128xf32>
    %cst_61 = arith.constant 5.000000e-01 : f32
    %142 = vector.broadcast %cst_61 : f32 to vector<8x128xf32>
    %143 = arith.mulf %142, %141 : vector<8x128xf32>
    %cst_62 = arith.constant 5.000000e-01 : f32
    %144 = vector.broadcast %cst_62 : f32 to vector<8x128xf32>
    %145 = arith.addf %143, %144 : vector<8x128xf32>
    %146 = vector.extract_strided_slice %137 {offsets = [0, 128], sizes = [8, 128], strides = [1, 1]} : vector<8x512xf32> to vector<8x128xf32>
    %cst_63 = arith.constant 5.000000e-01 : f32
    %147 = vector.broadcast %cst_63 : f32 to vector<8x128xf32>
    %148 = arith.mulf %147, %146 : vector<8x128xf32>
    %149 = math.tanh %148 : vector<8x128xf32>
    %cst_64 = arith.constant 5.000000e-01 : f32
    %150 = vector.broadcast %cst_64 : f32 to vector<8x128xf32>
    %151 = arith.mulf %150, %149 : vector<8x128xf32>
    %cst_65 = arith.constant 5.000000e-01 : f32
    %152 = vector.broadcast %cst_65 : f32 to vector<8x128xf32>
    %153 = arith.addf %151, %152 : vector<8x128xf32>
    %154 = vector.extract_strided_slice %137 {offsets = [0, 256], sizes = [8, 128], strides = [1, 1]} : vector<8x512xf32> to vector<8x128xf32>
    %155 = math.tanh %154 : vector<8x128xf32>
    %156 = vector.extract_strided_slice %137 {offsets = [0, 384], sizes = [8, 128], strides = [1, 1]} : vector<8x512xf32> to vector<8x128xf32>
    %cst_66 = arith.constant 5.000000e-01 : f32
    %157 = vector.broadcast %cst_66 : f32 to vector<8x128xf32>
    %158 = arith.mulf %157, %156 : vector<8x128xf32>
    %159 = math.tanh %158 : vector<8x128xf32>
    %cst_67 = arith.constant 5.000000e-01 : f32
    %160 = vector.broadcast %cst_67 : f32 to vector<8x128xf32>
    %161 = arith.mulf %160, %159 : vector<8x128xf32>
    %cst_68 = arith.constant 5.000000e-01 : f32
    %162 = vector.broadcast %cst_68 : f32 to vector<8x128xf32>
    %163 = arith.addf %161, %162 : vector<8x128xf32>
    %164 = arith.mulf %153, %124 : vector<8x128xf32>
    %165 = arith.mulf %145, %155 : vector<8x128xf32>
    %166 = arith.addf %164, %165 : vector<8x128xf32>
    %167 = math.tanh %166 : vector<8x128xf32>
    %168 = arith.mulf %163, %167 : vector<8x128xf32>
    %169 = arith.truncf %168 : vector<8x128xf32> to vector<8x128xbf16>
    %c3_69 = arith.constant 3 : index
    %c0_70 = arith.constant 0 : index
    %c0_71 = arith.constant 0 : index
    %170 = vector.load %arg6[%c3_69, %c0_70, %c0_71] : memref<8x8x128xbf16, #tpu.memory_space<vmem>>, vector<1x8x128xbf16>
    %171 = vector.shape_cast %170 : vector<1x8x128xbf16> to vector<8x128xbf16>
    %172 = vector.shape_cast %169 : vector<8x128xbf16> to vector<1x8x128xbf16>
    tpu.vector_store %arg6[%c3_69, %c0_70, %c0_71], %172 {strides = array<i32>} : memref<8x8x128xbf16, #tpu.memory_space<vmem>>, vector<1x8x128xbf16>,
    %c4 = arith.constant 4 : index
    %c0_72 = arith.constant 0 : index
    %c0_73 = arith.constant 0 : index
    %173 = vector.load %arg2[%c4, %c0_72, %c0_73] : memref<8x8x512xbf16, #tpu.memory_space<vmem>>, vector<1x8x512xbf16>
    %174 = vector.shape_cast %173 : vector<1x8x512xbf16> to vector<8x512xbf16>
    %175 = arith.extf %174 : vector<8x512xbf16> to vector<8x512xf32>
    %176 = arith.truncf %168 : vector<8x128xf32> to vector<8x128xbf16>
    %c0_74 = arith.constant 0 : index
    %c0_75 = arith.constant 0 : index
    %177 = vector.load %arg5[%c0_74, %c0_75] : memref<128x512xbf16, #tpu.memory_space<vmem>>, vector<128x512xbf16>
    %cst_76 = arith.constant dense<0.000000e+00> : vector<8x512xf32>
    %178 = tpu.matmul %176, %177, %cst_76 {dimension_numbers = #tpu.dot_dimension_numbers<[1], [0], [0], [1], [0, 0, 1, 1], [], []>} : vector<8x128xbf16>, vector<128x512xbf16>, vector<8x512xf32> -> vector<8x512xf32>
    %179 = arith.addf %175, %178 : vector<8x512xf32>
    %180 = vector.extract_strided_slice %179 {offsets = [0, 0], sizes = [8, 128], strides = [1, 1]} : vector<8x512xf32> to vector<8x128xf32>
    %cst_77 = arith.constant 5.000000e-01 : f32
    %181 = vector.broadcast %cst_77 : f32 to vector<8x128xf32>
    %182 = arith.mulf %181, %180 : vector<8x128xf32>
    %183 = math.tanh %182 : vector<8x128xf32>
    %cst_78 = arith.constant 5.000000e-01 : f32
    %184 = vector.broadcast %cst_78 : f32 to vector<8x128xf32>
    %185 = arith.mulf %184, %183 : vector<8x128xf32>
    %cst_79 = arith.constant 5.000000e-01 : f32
    %186 = vector.broadcast %cst_79 : f32 to vector<8x128xf32>
    %187 = arith.addf %185, %186 : vector<8x128xf32>
    %188 = vector.extract_strided_slice %179 {offsets = [0, 128], sizes = [8, 128], strides = [1, 1]} : vector<8x512xf32> to vector<8x128xf32>
    %cst_80 = arith.constant 5.000000e-01 : f32
    %189 = vector.broadcast %cst_80 : f32 to vector<8x128xf32>
    %190 = arith.mulf %189, %188 : vector<8x128xf32>
    %191 = math.tanh %190 : vector<8x128xf32>
    %cst_81 = arith.constant 5.000000e-01 : f32
    %192 = vector.broadcast %cst_81 : f32 to vector<8x128xf32>
    %193 = arith.mulf %192, %191 : vector<8x128xf32>
    %cst_82 = arith.constant 5.000000e-01 : f32
    %194 = vector.broadcast %cst_82 : f32 to vector<8x128xf32>
    %195 = arith.addf %193, %194 : vector<8x128xf32>
    %196 = vector.extract_strided_slice %179 {offsets = [0, 256], sizes = [8, 128], strides = [1, 1]} : vector<8x512xf32> to vector<8x128xf32>
    %197 = math.tanh %196 : vector<8x128xf32>
    %198 = vector.extract_strided_slice %179 {offsets = [0, 384], sizes = [8, 128], strides = [1, 1]} : vector<8x512xf32> to vector<8x128xf32>
    %cst_83 = arith.constant 5.000000e-01 : f32
    %199 = vector.broadcast %cst_83 : f32 to vector<8x128xf32>
    %200 = arith.mulf %199, %198 : vector<8x128xf32>
    %201 = math.tanh %200 : vector<8x128xf32>
    %cst_84 = arith.constant 5.000000e-01 : f32
    %202 = vector.broadcast %cst_84 : f32 to vector<8x128xf32>
    %203 = arith.mulf %202, %201 : vector<8x128xf32>
    %cst_85 = arith.constant 5.000000e-01 : f32
    %204 = vector.broadcast %cst_85 : f32 to vector<8x128xf32>
    %205 = arith.addf %203, %204 : vector<8x128xf32>
    %206 = arith.mulf %195, %166 : vector<8x128xf32>
    %207 = arith.mulf %187, %197 : vector<8x128xf32>
    %208 = arith.addf %206, %207 : vector<8x128xf32>
    %209 = math.tanh %208 : vector<8x128xf32>
    %210 = arith.mulf %205, %209 : vector<8x128xf32>
    %211 = arith.truncf %210 : vector<8x128xf32> to vector<8x128xbf16>
    %c4_86 = arith.constant 4 : index
    %c0_87 = arith.constant 0 : index
    %c0_88 = arith.constant 0 : index
    %212 = vector.load %arg6[%c4_86, %c0_87, %c0_88] : memref<8x8x128xbf16, #tpu.memory_space<vmem>>, vector<1x8x128xbf16>
    %213 = vector.shape_cast %212 : vector<1x8x128xbf16> to vector<8x128xbf16>
    %214 = vector.shape_cast %211 : vector<8x128xbf16> to vector<1x8x128xbf16>
    tpu.vector_store %arg6[%c4_86, %c0_87, %c0_88], %214 {strides = array<i32>} : memref<8x8x128xbf16, #tpu.memory_space<vmem>>, vector<1x8x128xbf16>,
    %c5 = arith.constant 5 : index
    %c0_89 = arith.constant 0 : index
    %c0_90 = arith.constant 0 : index
    %215 = vector.load %arg2[%c5, %c0_89, %c0_90] : memref<8x8x512xbf16, #tpu.memory_space<vmem>>, vector<1x8x512xbf16>
    %216 = vector.shape_cast %215 : vector<1x8x512xbf16> to vector<8x512xbf16>
    %217 = arith.extf %216 : vector<8x512xbf16> to vector<8x512xf32>
    %218 = arith.truncf %210 : vector<8x128xf32> to vector<8x128xbf16>
    %c0_91 = arith.constant 0 : index
    %c0_92 = arith.constant 0 : index
    %219 = vector.load %arg5[%c0_91, %c0_92] : memref<128x512xbf16, #tpu.memory_space<vmem>>, vector<128x512xbf16>
    %cst_93 = arith.constant dense<0.000000e+00> : vector<8x512xf32>
    %220 = tpu.matmul %218, %219, %cst_93 {dimension_numbers = #tpu.dot_dimension_numbers<[1], [0], [0], [1], [0, 0, 1, 1], [], []>} : vector<8x128xbf16>, vector<128x512xbf16>, vector<8x512xf32> -> vector<8x512xf32>
    %221 = arith.addf %217, %220 : vector<8x512xf32>
    %222 = vector.extract_strided_slice %221 {offsets = [0, 0], sizes = [8, 128], strides = [1, 1]} : vector<8x512xf32> to vector<8x128xf32>
    %cst_94 = arith.constant 5.000000e-01 : f32
    %223 = vector.broadcast %cst_94 : f32 to vector<8x128xf32>
    %224 = arith.mulf %223, %222 : vector<8x128xf32>
    %225 = math.tanh %224 : vector<8x128xf32>
    %cst_95 = arith.constant 5.000000e-01 : f32
    %226 = vector.broadcast %cst_95 : f32 to vector<8x128xf32>
    %227 = arith.mulf %226, %225 : vector<8x128xf32>
    %cst_96 = arith.constant 5.000000e-01 : f32
    %228 = vector.broadcast %cst_96 : f32 to vector<8x128xf32>
    %229 = arith.addf %227, %228 : vector<8x128xf32>
    %230 = vector.extract_strided_slice %221 {offsets = [0, 128], sizes = [8, 128], strides = [1, 1]} : vector<8x512xf32> to vector<8x128xf32>
    %cst_97 = arith.constant 5.000000e-01 : f32
    %231 = vector.broadcast %cst_97 : f32 to vector<8x128xf32>
    %232 = arith.mulf %231, %230 : vector<8x128xf32>
    %233 = math.tanh %232 : vector<8x128xf32>
    %cst_98 = arith.constant 5.000000e-01 : f32
    %234 = vector.broadcast %cst_98 : f32 to vector<8x128xf32>
    %235 = arith.mulf %234, %233 : vector<8x128xf32>
    %cst_99 = arith.constant 5.000000e-01 : f32
    %236 = vector.broadcast %cst_99 : f32 to vector<8x128xf32>
    %237 = arith.addf %235, %236 : vector<8x128xf32>
    %238 = vector.extract_strided_slice %221 {offsets = [0, 256], sizes = [8, 128], strides = [1, 1]} : vector<8x512xf32> to vector<8x128xf32>
    %239 = math.tanh %238 : vector<8x128xf32>
    %240 = vector.extract_strided_slice %221 {offsets = [0, 384], sizes = [8, 128], strides = [1, 1]} : vector<8x512xf32> to vector<8x128xf32>
    %cst_100 = arith.constant 5.000000e-01 : f32
    %241 = vector.broadcast %cst_100 : f32 to vector<8x128xf32>
    %242 = arith.mulf %241, %240 : vector<8x128xf32>
    %243 = math.tanh %242 : vector<8x128xf32>
    %cst_101 = arith.constant 5.000000e-01 : f32
    %244 = vector.broadcast %cst_101 : f32 to vector<8x128xf32>
    %245 = arith.mulf %244, %243 : vector<8x128xf32>
    %cst_102 = arith.constant 5.000000e-01 : f32
    %246 = vector.broadcast %cst_102 : f32 to vector<8x128xf32>
    %247 = arith.addf %245, %246 : vector<8x128xf32>
    %248 = arith.mulf %237, %208 : vector<8x128xf32>
    %249 = arith.mulf %229, %239 : vector<8x128xf32>
    %250 = arith.addf %248, %249 : vector<8x128xf32>
    %251 = math.tanh %250 : vector<8x128xf32>
    %252 = arith.mulf %247, %251 : vector<8x128xf32>
    %253 = arith.truncf %252 : vector<8x128xf32> to vector<8x128xbf16>
    %c5_103 = arith.constant 5 : index
    %c0_104 = arith.constant 0 : index
    %c0_105 = arith.constant 0 : index
    %254 = vector.load %arg6[%c5_103, %c0_104, %c0_105] : memref<8x8x128xbf16, #tpu.memory_space<vmem>>, vector<1x8x128xbf16>
    %255 = vector.shape_cast %254 : vector<1x8x128xbf16> to vector<8x128xbf16>
    %256 = vector.shape_cast %253 : vector<8x128xbf16> to vector<1x8x128xbf16>
    tpu.vector_store %arg6[%c5_103, %c0_104, %c0_105], %256 {strides = array<i32>} : memref<8x8x128xbf16, #tpu.memory_space<vmem>>, vector<1x8x128xbf16>,
    %c6 = arith.constant 6 : index
    %c0_106 = arith.constant 0 : index
    %c0_107 = arith.constant 0 : index
    %257 = vector.load %arg2[%c6, %c0_106, %c0_107] : memref<8x8x512xbf16, #tpu.memory_space<vmem>>, vector<1x8x512xbf16>
    %258 = vector.shape_cast %257 : vector<1x8x512xbf16> to vector<8x512xbf16>
    %259 = arith.extf %258 : vector<8x512xbf16> to vector<8x512xf32>
    %260 = arith.truncf %252 : vector<8x128xf32> to vector<8x128xbf16>
    %c0_108 = arith.constant 0 : index
    %c0_109 = arith.constant 0 : index
    %261 = vector.load %arg5[%c0_108, %c0_109] : memref<128x512xbf16, #tpu.memory_space<vmem>>, vector<128x512xbf16>
    %cst_110 = arith.constant dense<0.000000e+00> : vector<8x512xf32>
    %262 = tpu.matmul %260, %261, %cst_110 {dimension_numbers = #tpu.dot_dimension_numbers<[1], [0], [0], [1], [0, 0, 1, 1], [], []>} : vector<8x128xbf16>, vector<128x512xbf16>, vector<8x512xf32> -> vector<8x512xf32>
    %263 = arith.addf %259, %262 : vector<8x512xf32>
    %264 = vector.extract_strided_slice %263 {offsets = [0, 0], sizes = [8, 128], strides = [1, 1]} : vector<8x512xf32> to vector<8x128xf32>
    %cst_111 = arith.constant 5.000000e-01 : f32
    %265 = vector.broadcast %cst_111 : f32 to vector<8x128xf32>
    %266 = arith.mulf %265, %264 : vector<8x128xf32>
    %267 = math.tanh %266 : vector<8x128xf32>
    %cst_112 = arith.constant 5.000000e-01 : f32
    %268 = vector.broadcast %cst_112 : f32 to vector<8x128xf32>
    %269 = arith.mulf %268, %267 : vector<8x128xf32>
    %cst_113 = arith.constant 5.000000e-01 : f32
    %270 = vector.broadcast %cst_113 : f32 to vector<8x128xf32>
    %271 = arith.addf %269, %270 : vector<8x128xf32>
    %272 = vector.extract_strided_slice %263 {offsets = [0, 128], sizes = [8, 128], strides = [1, 1]} : vector<8x512xf32> to vector<8x128xf32>
    %cst_114 = arith.constant 5.000000e-01 : f32
    %273 = vector.broadcast %cst_114 : f32 to vector<8x128xf32>
    %274 = arith.mulf %273, %272 : vector<8x128xf32>
    %275 = math.tanh %274 : vector<8x128xf32>
    %cst_115 = arith.constant 5.000000e-01 : f32
    %276 = vector.broadcast %cst_115 : f32 to vector<8x128xf32>
    %277 = arith.mulf %276, %275 : vector<8x128xf32>
    %cst_116 = arith.constant 5.000000e-01 : f32
    %278 = vector.broadcast %cst_116 : f32 to vector<8x128xf32>
    %279 = arith.addf %277, %278 : vector<8x128xf32>
    %280 = vector.extract_strided_slice %263 {offsets = [0, 256], sizes = [8, 128], strides = [1, 1]} : vector<8x512xf32> to vector<8x128xf32>
    %281 = math.tanh %280 : vector<8x128xf32>
    %282 = vector.extract_strided_slice %263 {offsets = [0, 384], sizes = [8, 128], strides = [1, 1]} : vector<8x512xf32> to vector<8x128xf32>
    %cst_117 = arith.constant 5.000000e-01 : f32
    %283 = vector.broadcast %cst_117 : f32 to vector<8x128xf32>
    %284 = arith.mulf %283, %282 : vector<8x128xf32>
    %285 = math.tanh %284 : vector<8x128xf32>
    %cst_118 = arith.constant 5.000000e-01 : f32
    %286 = vector.broadcast %cst_118 : f32 to vector<8x128xf32>
    %287 = arith.mulf %286, %285 : vector<8x128xf32>
    %cst_119 = arith.constant 5.000000e-01 : f32
    %288 = vector.broadcast %cst_119 : f32 to vector<8x128xf32>
    %289 = arith.addf %287, %288 : vector<8x128xf32>
    %290 = arith.mulf %279, %250 : vector<8x128xf32>
    %291 = arith.mulf %271, %281 : vector<8x128xf32>
    %292 = arith.addf %290, %291 : vector<8x128xf32>
    %293 = math.tanh %292 : vector<8x128xf32>
    %294 = arith.mulf %289, %293 : vector<8x128xf32>
    %295 = arith.truncf %294 : vector<8x128xf32> to vector<8x128xbf16>
    %c6_120 = arith.constant 6 : index
    %c0_121 = arith.constant 0 : index
    %c0_122 = arith.constant 0 : index
    %296 = vector.load %arg6[%c6_120, %c0_121, %c0_122] : memref<8x8x128xbf16, #tpu.memory_space<vmem>>, vector<1x8x128xbf16>
    %297 = vector.shape_cast %296 : vector<1x8x128xbf16> to vector<8x128xbf16>
    %298 = vector.shape_cast %295 : vector<8x128xbf16> to vector<1x8x128xbf16>
    tpu.vector_store %arg6[%c6_120, %c0_121, %c0_122], %298 {strides = array<i32>} : memref<8x8x128xbf16, #tpu.memory_space<vmem>>, vector<1x8x128xbf16>,
    %c7 = arith.constant 7 : index
    %c0_123 = arith.constant 0 : index
    %c0_124 = arith.constant 0 : index
    %299 = vector.load %arg2[%c7, %c0_123, %c0_124] : memref<8x8x512xbf16, #tpu.memory_space<vmem>>, vector<1x8x512xbf16>
    %300 = vector.shape_cast %299 : vector<1x8x512xbf16> to vector<8x512xbf16>
    %301 = arith.extf %300 : vector<8x512xbf16> to vector<8x512xf32>
    %302 = arith.truncf %294 : vector<8x128xf32> to vector<8x128xbf16>
    %c0_125 = arith.constant 0 : index
    %c0_126 = arith.constant 0 : index
    %303 = vector.load %arg5[%c0_125, %c0_126] : memref<128x512xbf16, #tpu.memory_space<vmem>>, vector<128x512xbf16>
    %cst_127 = arith.constant dense<0.000000e+00> : vector<8x512xf32>
    %304 = tpu.matmul %302, %303, %cst_127 {dimension_numbers = #tpu.dot_dimension_numbers<[1], [0], [0], [1], [0, 0, 1, 1], [], []>} : vector<8x128xbf16>, vector<128x512xbf16>, vector<8x512xf32> -> vector<8x512xf32>
    %305 = arith.addf %301, %304 : vector<8x512xf32>
    %306 = vector.extract_strided_slice %305 {offsets = [0, 0], sizes = [8, 128], strides = [1, 1]} : vector<8x512xf32> to vector<8x128xf32>
    %cst_128 = arith.constant 5.000000e-01 : f32
    %307 = vector.broadcast %cst_128 : f32 to vector<8x128xf32>
    %308 = arith.mulf %307, %306 : vector<8x128xf32>
    %309 = math.tanh %308 : vector<8x128xf32>
    %cst_129 = arith.constant 5.000000e-01 : f32
    %310 = vector.broadcast %cst_129 : f32 to vector<8x128xf32>
    %311 = arith.mulf %310, %309 : vector<8x128xf32>
    %cst_130 = arith.constant 5.000000e-01 : f32
    %312 = vector.broadcast %cst_130 : f32 to vector<8x128xf32>
    %313 = arith.addf %311, %312 : vector<8x128xf32>
    %314 = vector.extract_strided_slice %305 {offsets = [0, 128], sizes = [8, 128], strides = [1, 1]} : vector<8x512xf32> to vector<8x128xf32>
    %cst_131 = arith.constant 5.000000e-01 : f32
    %315 = vector.broadcast %cst_131 : f32 to vector<8x128xf32>
    %316 = arith.mulf %315, %314 : vector<8x128xf32>
    %317 = math.tanh %316 : vector<8x128xf32>
    %cst_132 = arith.constant 5.000000e-01 : f32
    %318 = vector.broadcast %cst_132 : f32 to vector<8x128xf32>
    %319 = arith.mulf %318, %317 : vector<8x128xf32>
    %cst_133 = arith.constant 5.000000e-01 : f32
    %320 = vector.broadcast %cst_133 : f32 to vector<8x128xf32>
    %321 = arith.addf %319, %320 : vector<8x128xf32>
    %322 = vector.extract_strided_slice %305 {offsets = [0, 256], sizes = [8, 128], strides = [1, 1]} : vector<8x512xf32> to vector<8x128xf32>
    %323 = math.tanh %322 : vector<8x128xf32>
    %324 = vector.extract_strided_slice %305 {offsets = [0, 384], sizes = [8, 128], strides = [1, 1]} : vector<8x512xf32> to vector<8x128xf32>
    %cst_134 = arith.constant 5.000000e-01 : f32
    %325 = vector.broadcast %cst_134 : f32 to vector<8x128xf32>
    %326 = arith.mulf %325, %324 : vector<8x128xf32>
    %327 = math.tanh %326 : vector<8x128xf32>
    %cst_135 = arith.constant 5.000000e-01 : f32
    %328 = vector.broadcast %cst_135 : f32 to vector<8x128xf32>
    %329 = arith.mulf %328, %327 : vector<8x128xf32>
    %cst_136 = arith.constant 5.000000e-01 : f32
    %330 = vector.broadcast %cst_136 : f32 to vector<8x128xf32>
    %331 = arith.addf %329, %330 : vector<8x128xf32>
    %332 = arith.mulf %321, %292 : vector<8x128xf32>
    %333 = arith.mulf %313, %323 : vector<8x128xf32>
    %334 = arith.addf %332, %333 : vector<8x128xf32>
    %335 = math.tanh %334 : vector<8x128xf32>
    %336 = arith.mulf %331, %335 : vector<8x128xf32>
    %337 = arith.truncf %336 : vector<8x128xf32> to vector<8x128xbf16>
    %c7_137 = arith.constant 7 : index
    %c0_138 = arith.constant 0 : index
    %c0_139 = arith.constant 0 : index
    %338 = vector.load %arg6[%c7_137, %c0_138, %c0_139] : memref<8x8x128xbf16, #tpu.memory_space<vmem>>, vector<1x8x128xbf16>
    %339 = vector.shape_cast %338 : vector<1x8x128xbf16> to vector<8x128xbf16>
    %340 = vector.shape_cast %337 : vector<8x128xbf16> to vector<1x8x128xbf16>
    tpu.vector_store %arg6[%c7_137, %c0_138, %c0_139], %340 {strides = array<i32>} : memref<8x8x128xbf16, #tpu.memory_space<vmem>>, vector<1x8x128xbf16>,
    %c0_140 = arith.constant 0 : index
    %c0_141 = arith.constant 0 : index
    %341 = vector.load %arg9[%c0_140, %c0_141] : memref<8x128xf32, #tpu.memory_space<vmem>>, vector<8x128xf32>
    tpu.vector_store %arg9[%c0_140, %c0_141], %336 {strides = array<i32>} : memref<8x128xf32, #tpu.memory_space<vmem>>, vector<8x128xf32>,
    %c0_142 = arith.constant 0 : index
    %c0_143 = arith.constant 0 : index
    %342 = vector.load %arg10[%c0_142, %c0_143] : memref<8x128xf32, #tpu.memory_space<vmem>>, vector<8x128xf32>
    tpu.vector_store %arg10[%c0_142, %c0_143], %334 {strides = array<i32>} : memref<8x128xf32, #tpu.memory_space<vmem>>, vector<8x128xf32>,
    %c0_i32_144 = arith.constant 0 : i32
    %343 = arith.cmpi eq, %arg1, %c0_i32_144 : i32
    %344 = arith.extui %343 : i1 to i32
    %c0_i32_145 = arith.constant 0 : i32
    %345 = arith.cmpi ne, %344, %c0_i32_145 : i32
    scf.if %345 {
      %c0_146 = arith.constant 0 : index
      %c0_147 = arith.constant 0 : index
      %346 = vector.load %arg9[%c0_146, %c0_147] : memref<8x128xf32, #tpu.memory_space<vmem>>, vector<8x128xf32>
      %c0_148 = arith.constant 0 : index
      %c0_149 = arith.constant 0 : index
      %347 = vector.load %arg7[%c0_148, %c0_149] : memref<8x128xf32, #tpu.memory_space<vmem>>, vector<8x128xf32>
      tpu.vector_store %arg7[%c0_148, %c0_149], %346 {strides = array<i32>} : memref<8x128xf32, #tpu.memory_space<vmem>>, vector<8x128xf32>,
      %c0_150 = arith.constant 0 : index
      %c0_151 = arith.constant 0 : index
      %348 = vector.load %arg10[%c0_150, %c0_151] : memref<8x128xf32, #tpu.memory_space<vmem>>, vector<8x128xf32>
      %c0_152 = arith.constant 0 : index
      %c0_153 = arith.constant 0 : index
      %349 = vector.load %arg8[%c0_152, %c0_153] : memref<8x128xf32, #tpu.memory_space<vmem>>, vector<8x128xf32>
      tpu.vector_store %arg8[%c0_152, %c0_153], %348 {strides = array<i32>} : memref<8x128xf32, #tpu.memory_space<vmem>>, vector<8x128xf32>,
    } else {
    }
    return
  }
  func.func @transform_0(%arg0: i32, %arg1: i32) -> (i32, i32, i32) {
    %c0_i32 = arith.constant 0 : i32
    %c0_i32_0 = arith.constant 0 : i32
    return %arg1, %arg0, %c0_i32 : i32, i32, i32
  }
  func.func @transform_1(%arg0: i32, %arg1: i32) -> (i32, i32) {
    %c0_i32 = arith.constant 0 : i32
    %c0_i32_0 = arith.constant 0 : i32
    return %arg0, %c0_i32 : i32, i32
  }
  func.func @transform_2(%arg0: i32, %arg1: i32) -> (i32, i32) {
    %c0_i32 = arith.constant 0 : i32
    %c0_i32_0 = arith.constant 0 : i32
    return %arg0, %c0_i32 : i32, i32
  }
  func.func @transform_3(%arg0: i32, %arg1: i32) -> (i32, i32) {
    %c0_i32 = arith.constant 0 : i32
    %c0_i32_0 = arith.constant 0 : i32
    %c0_i32_1 = arith.constant 0 : i32
    return %c0_i32, %c0_i32_0 : i32, i32
  }
  func.func @transform_4(%arg0: i32, %arg1: i32) -> (i32, i32, i32) {
    %c0_i32 = arith.constant 0 : i32
    %c0_i32_0 = arith.constant 0 : i32
    return %arg1, %arg0, %c0_i32 : i32, i32, i32
  }
  func.func @transform_5(%arg0: i32, %arg1: i32) -> (i32, i32) {
    %c0_i32 = arith.constant 0 : i32
    %c0_i32_0 = arith.constant 0 : i32
    return %arg0, %c0_i32 : i32, i32
  }
  func.func @transform_6(%arg0: i32, %arg1: i32) -> (i32, i32) {
    %c0_i32 = arith.constant 0 : i32
    %c0_i32_0 = arith.constant 0 : i32
    return %arg0, %c0_i32 : i32, i32
  }
}

</mosaic_0001>

<bundles_post_ra>
// kernel: lstm_lm_forward.9
= control target key start
LH: loop header
LB: loop body
LE: loop exit
PB: predicated region body
PF: predicated region fallthrough
CT: control target
= control target key end

     0   :  { %s355_s1 = inlined_call_operand.vmem [shape: bf16[128,128], index: 1, kind: input, shape index: {}]   ;;  %s356_s0 = inlined_call_operand.vmem [shape: bf16[64,128], index: 0, kind: input, shape index: {}]   ;;  %s357_s2 = inlined_call_operand.vmem [shape: f32[1,128], index: 2, kind: input, shape index: {}]   ;;  %s358_s3 = inlined_call_operand.vmem [shape: f32[64,128], index: 3, kind: output, shape index: {}]  }
   0x1   :  { %v260_v0 = vld [vmem:[%s355_s1] sm:$0xff]   ;;  %v261_v1 = vld [vmem:[%s355_s1 + $0x8] sm:$0xff]   ;;  %v262_v2 = vld [vmem:[%s355_s1 + $0x10] sm:$0xff]  }
   0x2   :  { %220 = vmatprep.subr.bf16.mxu0 %v260_v0  ;;  %244 = vmatprep.subr.bf16.mxu1 %v260_v0  ;;  %v263_v3 = vld [vmem:[%s355_s1 + $0x18] sm:$0xff]   ;;  %v268_v4 = vld [vmem:[%s356_s0] sm:$0xff]   ;;  %v269_v5 = vld [vmem:[%s356_s0 + $0x10] sm:$0xff]  }
   0x3   :  { %221 = vmatpush3.bf16.msra.mxu0 %v260_v0  ;;  %252 = vmatpush3.bf16.msra.mxu1 %v260_v0  ;;  %v264_v6 = vld [vmem:[%s355_s1 + $0x20] sm:$0xff]   ;;  %v265_v7 = vld [vmem:[%s355_s1 + $0x28] sm:$0xff]   ;;  %v266_v8 = vld [vmem:[%s355_s1 + $0x30] sm:$0xff]  }
   0x4   :  { %222 = vmatprep.subr.bf16.mxu0 %v261_v1  ;;  %245 = vmatprep.subr.bf16.mxu1 %v261_v1  ;;  %v267_v9 = vld [vmem:[%s355_s1 + $0x38] sm:$0xff]   ;;  %v270_v10 = vld [vmem:[%s356_s0 + $0x8] sm:$0xff]   ;;  %v195_v12 = vld [vmem:[%s357_s2] ss:$0 sm:$0xff] }
   0x5   :  { %236 = vmatprep.mubr.bf16.mxu0 %v268_v4  ;;  %240 = vmatprep.mubr.bf16.mxu1 %v269_v5  ;;  %v271_v11 = vld [vmem:[%s356_s0 + $0x18] sm:$0xff]  }
   0x7   :  { %223 = vmatpush3.bf16.msra.mxu0 %v261_v1  ;;  %253 = vmatpush3.bf16.msra.mxu1 %v261_v1 }
   0x8   :  { %224 = vmatprep.subr.bf16.mxu0 %v262_v2  ;;  %246 = vmatprep.subr.bf16.mxu1 %v262_v2 }
   0xb   :  { %225 = vmatpush3.bf16.msra.mxu0 %v262_v2  ;;  %254 = vmatpush3.bf16.msra.mxu1 %v262_v2 }
   0xc   :  { %226 = vmatprep.subr.bf16.mxu0 %v263_v3  ;;  %247 = vmatprep.subr.bf16.mxu1 %v263_v3 }
   0xf   :  { %227 = vmatpush3.bf16.msra.mxu0 %v263_v3  ;;  %255 = vmatpush3.bf16.msra.mxu1 %v263_v3 }
  0x10   :  { %228 = vmatprep.subr.bf16.mxu0 %v264_v6  ;;  %248 = vmatprep.subr.bf16.mxu1 %v264_v6 }
  0x13   :  { %229 = vmatpush3.bf16.msra.mxu0 %v264_v6  ;;  %256 = vmatpush3.bf16.msra.mxu1 %v264_v6 }
  0x14   :  { %230 = vmatprep.subr.bf16.mxu0 %v265_v7  ;;  %249 = vmatprep.subr.bf16.mxu1 %v265_v7 }
  0x17   :  { %231 = vmatpush3.bf16.msra.mxu0 %v265_v7  ;;  %257 = vmatpush3.bf16.msra.mxu1 %v265_v7 }
  0x18   :  { %232 = vmatprep.subr.bf16.mxu0 %v266_v8  ;;  %250 = vmatprep.subr.bf16.mxu1 %v266_v8 }
  0x1b   :  { %233 = vmatpush3.bf16.msra.mxu0 %v266_v8  ;;  %258 = vmatpush3.bf16.msra.mxu1 %v266_v8 }
  0x1c   :  { %234 = vmatprep.subr.bf16.mxu0 %v267_v9  ;;  %251 = vmatprep.subr.bf16.mxu1 %v267_v9 }
  0x1f   :  { %235 = vmatpush3.bf16.msra.mxu0 %v267_v9  ;;  %259 = vmatpush3.bf16.msra.mxu1 %v267_v9 }
  0x22   :  { %237 = vmatmul.mubr.bf16.vlgmr.msra.gmra.mrb[0].mxu0 %v270_v10  ;;  %241 = vmatmul.mubr.bf16.vlgmr.msra.gmra.mrb[0].mxu1 %v271_v11 }
  0xf5   :  { %v238_v13 = vpop.f32.mrb[0].mxu0  ;;  %v242_v14 = vpop.f32.mrb[0].mxu1 }
  0xf6   :  { %v161_v15 = vadd.f32 %v238_v13, %v195_v12  ;;  %v177_v16 = vadd.f32 %v242_v14, %v195_v12  ;;  %v152_v17 = vpop.f32.mrb[1].mxu0  ;;  %v168_v18 = vpop.f32.mrb[1].mxu1 }
  0xf7   :  { %v153_v19 = vadd.f32 %v195_v12, %v152_v17  ;;  %v169_v20 = vadd.f32 %v195_v12, %v168_v18  ;;  %v239_v21 = vpop.f32.mrb[2].mxu0  ;;  %v243_v22 = vpop.f32.mrb[2].mxu1 }
  0xf8   :  { %185 = vst [vmem:[%s358_s3 + $0x10] sm:$0xff] %v161_v15  ;;  %189 = vst [vmem:[%s358_s3 + $0x30] sm:$0xff] %v177_v16  ;;  %v164_v23 = vadd.f32 %v239_v21, %v195_v12  ;;  %v180_v24 = vadd.f32 %v243_v22, %v195_v12  ;;  %v155_v25 = vpop.f32.mrb[3].mxu0  ;;  %v171_v26 = vpop.f32.mrb[3].mxu1 }
  0xf9   :  { %183 = vst [vmem:[%s358_s3] sm:$0xff] %v153_v19  ;;  %187 = vst [vmem:[%s358_s3 + $0x20] sm:$0xff] %v169_v20  ;;  %v156_v27 = vadd.f32 %v195_v12, %v155_v25  ;;  %v172_v28 = vadd.f32 %v195_v12, %v171_v26 }
  0xfa   :  { %186 = vst [vmem:[%s358_s3 + $0x18] sm:$0xff] %v164_v23  ;;  %190 = vst [vmem:[%s358_s3 + $0x38] sm:$0xff] %v180_v24 }
  0xfb   :  { %184 = vst [vmem:[%s358_s3 + $0x8] sm:$0xff] %v156_v27  ;;  %188 = vst [vmem:[%s358_s3 + $0x28] sm:$0xff] %v172_v28 }

// kernel: lstm_lm_forward.5
= control target key start
LH: loop header
LB: loop body
LE: loop exit
PB: predicated region body
PF: predicated region fallthrough
CT: control target
= control target key end

     0   :  { %v644_v1 = vmov 0   ;;  %v57_v37 = vlaneseq  ;;  %s872_s1 = inlined_call_operand.vmem [shape: bf16[128,512], index: 1, kind: input, shape index: {}]   ;;  %s873_s0 = inlined_call_operand.vmem [shape: bf16[64,128], index: 0, kind: input, shape index: {}]   ;;  %s874_s2 = inlined_call_operand.vmem [shape: f32[1,512], index: 2, kind: input, shape index: {}]   ;;  %s875_s3 = inlined_call_operand.vmem [shape: bf16[64,512], index: 3, kind: output, shape index: {}]  }
   0x1   :  { %v592_v0 = vld [vmem:[%s872_s1 + $0x4] ss:$16 sps:$4 sm:$0xff]   ;;  %293 = vmatprep.mubr.bf16.mxu0 %v644_v1  ;;  %366 = vmatprep.mubr.bf16.mxu1 %v644_v1  ;;  %v594_v2 = vld [vmem:[%s872_s1 + $0xc] ss:$16 sps:$4 sm:$0xff]   ;;  %v596_v3 = vld [vmem:[%s872_s1] ss:$16 sps:$4 sm:$0xff]  }
   0x2   :  { %261 = vmatprep.subr.bf16.mxu0 %v592_v0  ;;  %v597_v4 = vld [vmem:[%s872_s1 + $0x8] ss:$16 sps:$4 sm:$0xff]   ;;  %334 = vmatprep.subr.bf16.mxu1 %v594_v2  ;;  %v598_v5 = vld [vmem:[%s872_s1 + $0x24] ss:$16 sps:$4 sm:$0xff]   ;;  %v600_v6 = vld [vmem:[%s872_s1 + $0x2c] ss:$16 sps:$4 sm:$0xff]  }
   0x3   :  { %262 = vmatpush1.bf16.msra.mxu0 %v596_v3  ;;  %335 = vmatpush1.bf16.msra.mxu1 %v597_v4  ;;  %v602_v7 = vld [vmem:[%s872_s1 + $0x20] ss:$16 sps:$4 sm:$0xff]   ;;  %v603_v8 = vld [vmem:[%s872_s1 + $0x28] ss:$16 sps:$4 sm:$0xff]   ;;  %v604_v9 = vld [vmem:[%s872_s1 + $0x44] ss:$16 sps:$4 sm:$0xff]  }
   0x4   :  { %263 = vmatprep.subr.bf16.mxu0 %v598_v5  ;;  %336 = vmatprep.subr.bf16.mxu1 %v600_v6  ;;  %v606_v10 = vld [vmem:[%s872_s1 + $0x4c] ss:$16 sps:$4 sm:$0xff]   ;;  %v608_v11 = vld [vmem:[%s872_s1 + $0x40] ss:$16 sps:$4 sm:$0xff]   ;;  %v609_v12 = vld [vmem:[%s872_s1 + $0x48] ss:$16 sps:$4 sm:$0xff]  }
   0x5   :  { %v610_v13 = vld [vmem:[%s872_s1 + $0x64] ss:$16 sps:$4 sm:$0xff]   ;;  %v612_v14 = vld [vmem:[%s872_s1 + $0x6c] ss:$16 sps:$4 sm:$0xff]   ;;  %v614_v15 = vld [vmem:[%s872_s1 + $0x60] ss:$16 sps:$4 sm:$0xff]  }
   0x6   :  { %v615_v16 = vld [vmem:[%s872_s1 + $0x68] ss:$16 sps:$4 sm:$0xff]   ;;  %v616_v17 = vld [vmem:[%s872_s1 + $0x84] ss:$16 sps:$4 sm:$0xff]   ;;  %v618_v18 = vld [vmem:[%s872_s1 + $0x8c] ss:$16 sps:$4 sm:$0xff]  }
   0x7   :  { %264 = vmatpush1.bf16.msra.mxu0 %v602_v7  ;;  %337 = vmatpush1.bf16.msra.mxu1 %v603_v8  ;;  %v620_v19 = vld [vmem:[%s872_s1 + $0x80] ss:$16 sps:$4 sm:$0xff]   ;;  %v621_v20 = vld [vmem:[%s872_s1 + $0x88] ss:$16 sps:$4 sm:$0xff]   ;;  %v622_v21 = vld [vmem:[%s872_s1 + $0xa4] ss:$16 sps:$4 sm:$0xff]  }
   0x8   :  { %265 = vmatprep.subr.bf16.mxu0 %v604_v9  ;;  %338 = vmatprep.subr.bf16.mxu1 %v606_v10  ;;  %v624_v22 = vld [vmem:[%s872_s1 + $0xac] ss:$16 sps:$4 sm:$0xff]   ;;  %v626_v23 = vld [vmem:[%s872_s1 + $0xa0] ss:$16 sps:$4 sm:$0xff]   ;;  %v627_v24 = vld [vmem:[%s872_s1 + $0xa8] ss:$16 sps:$4 sm:$0xff]  }
   0x9   :  { %v628_v25 = vld [vmem:[%s872_s1 + $0xc4] ss:$16 sps:$4 sm:$0xff]   ;;  %v630_v26 = vld [vmem:[%s872_s1 + $0xcc] ss:$16 sps:$4 sm:$0xff]   ;;  %v632_v27 = vld [vmem:[%s872_s1 + $0xc0] ss:$16 sps:$4 sm:$0xff]  }
   0xa   :  { %v633_v28 = vld [vmem:[%s872_s1 + $0xc8] ss:$16 sps:$4 sm:$0xff]   ;;  %v634_v29 = vld [vmem:[%s872_s1 + $0xe4] ss:$16 sps:$4 sm:$0xff]   ;;  %v636_v30 = vld [vmem:[%s872_s1 + $0xec] ss:$16 sps:$4 sm:$0xff]  }
   0xb   :  { %266 = vmatpush1.bf16.msra.mxu0 %v608_v11  ;;  %339 = vmatpush1.bf16.msra.mxu1 %v609_v12  ;;  %v638_v31 = vld [vmem:[%s872_s1 + $0xe0] ss:$16 sps:$4 sm:$0xff]   ;;  %v639_v32 = vld [vmem:[%s872_s1 + $0xe8] ss:$16 sps:$4 sm:$0xff]   ;;  %v58_v38 = vshrl.u32 %v57_v37, 7 }
   0xc   :  { %267 = vmatprep.subr.bf16.mxu0 %v610_v13  ;;  %340 = vmatprep.subr.bf16.mxu1 %v612_v14  ;;  %v640_v33 = vld [vmem:[%s873_s0] sm:$0xff]   ;;  %v641_v34 = vld [vmem:[%s873_s0 + $0x8] sm:$0xff]   ;;  %v642_v35 = vld [vmem:[%s873_s0 + $0x10] sm:$0xff]  }
   0xd   :  { %v643_v36 = vld [vmem:[%s873_s0 + $0x18] sm:$0xff]   ;;  %v59_v39 = vsub.s32 0, %v58_v38  ;;  %v67_v40 = vsub.s32 2, %v58_v38  ;;  %v55_v41 = vld [vmem:[%s874_s2] sm:$0xf]  ;;  %v63_v42 = vsub.s32 1, %v58_v38 }
   0xe   :  { %v71_v43 = vsub.s32 3, %v58_v38 }
   0xf   :  { %268 = vmatpush1.bf16.msra.mxu0 %v614_v15  ;;  %341 = vmatpush1.bf16.msra.mxu1 %v615_v16  ;;  %v784_v44 = vrot.slane %v55_v41, %v59_v39  ;;  %v786_v45 = vrot.slane %v55_v41, %v67_v40  ;;  %v788_v46 = vrot.slane %v55_v41, %v63_v42 }
  0x10   :  { %269 = vmatprep.subr.bf16.mxu0 %v616_v17  ;;  %342 = vmatprep.subr.bf16.mxu1 %v618_v18  ;;  %v790_v47 = vrot.slane %v55_v41, %v71_v43 }
  0x13   :  { %270 = vmatpush1.bf16.msra.mxu0 %v620_v19  ;;  %343 = vmatpush1.bf16.msra.mxu1 %v621_v20 }
  0x14   :  { %271 = vmatprep.subr.bf16.mxu0 %v622_v21  ;;  %344 = vmatprep.subr.bf16.mxu1 %v624_v22 }
  0x17   :  { %272 = vmatpush1.bf16.msra.mxu0 %v626_v23  ;;  %345 = vmatpush1.bf16.msra.mxu1 %v627_v24 }
  0x18   :  { %273 = vmatprep.subr.bf16.mxu0 %v628_v25  ;;  %346 = vmatprep.subr.bf16.mxu1 %v630_v26 }
  0x1b   :  { %274 = vmatpush1.bf16.msra.mxu0 %v632_v27  ;;  %347 = vmatpush1.bf16.msra.mxu1 %v633_v28 }
  0x1c   :  { %275 = vmatprep.subr.bf16.mxu0 %v634_v29  ;;  %348 = vmatprep.subr.bf16.mxu1 %v636_v30 }
  0x1f   :  { %276 = vmatpush1.bf16.msra.mxu0 %v638_v31  ;;  %349 = vmatpush1.bf16.msra.mxu1 %v639_v32 }
  0x22   :  { %294 = vmatmul.mubr.bf16.vlgmr.msra.gmra.mrb[0].mxu0 %v640_v33  ;;  %367 = vmatmul.mubr.bf16.vlgmr.msra.gmra.mrb[0].mxu1 %v640_v33 }
  0x23   :  { %303 = vmatprep.mubr.bf16.mxu0 %v644_v1  ;;  %376 = vmatprep.mubr.bf16.mxu1 %v644_v1 }
  0x2a   :  { %304 = vmatmul.mubr.bf16.gmra.mrb[4].mxu0 %v641_v34  ;;  %377 = vmatmul.mubr.bf16.gmra.mrb[4].mxu1 %v641_v34 }
  0x2b   :  { %313 = vmatprep.mubr.bf16.mxu0 %v644_v1  ;;  %386 = vmatprep.mubr.bf16.mxu1 %v644_v1 }
  0x32   :  { %314 = vmatmul.mubr.bf16.gmra.mrb[8].mxu0 %v642_v35  ;;  %387 = vmatmul.mubr.bf16.gmra.mrb[8].mxu1 %v642_v35 }
  0x33   :  { %323 = vmatprep.mubr.bf16.mxu0 %v644_v1  ;;  %396 = vmatprep.mubr.bf16.mxu1 %v644_v1 }
  0x3a   :  { %324 = vmatmul.mubr.bf16.gmra.mrb[12].mxu0 %v643_v36  ;;  %397 = vmatmul.mubr.bf16.gmra.mrb[12].mxu1 %v643_v36 }
  0xf5   :  { %v295_v48 = vpop.f32.mrb[0].mxu0  ;;  %v368_v49 = vpop.f32.mrb[0].mxu1 }
  0xf6   :  { %v296_v50 = vadd.f32 %v295_v48, %v784_v44  ;;  %v369_v51 = vadd.f32 %v368_v49, %v786_v45  ;;  %v297_v52 = vpop.f32.mrb[1].mxu0  ;;  %v370_v53 = vpop.f32.mrb[1].mxu1 }
  0xf7   :  { %v298_v54 = vadd.f32 %v297_v52, %v788_v46  ;;  %v371_v55 = vadd.f32 %v370_v53, %v790_v47  ;;  %v299_v56 = vpop.f32.mrb[2].mxu0  ;;  %v372_v57 = vpop.f32.mrb[2].mxu1 }
  0xf8   :  { %v300_v58 = vadd.f32 %v299_v56, %v784_v44  ;;  %v373_v59 = vadd.f32 %v372_v57, %v786_v45  ;;  %v301_v60 = vpop.f32.mrb[3].mxu0  ;;  %v374_v61 = vpop.f32.mrb[3].mxu1 }
  0xf9   :  { %v575_v62 = vpack.c.bf16 %v298_v54, %v296_v50  ;;  %v576_v63 = vpack.c.bf16 %v371_v55, %v369_v51  ;;  %v302_v0 = vadd.f32 %v301_v60, %v788_v46  ;;  %v375_v1 = vadd.f32 %v374_v61, %v790_v47 }
  0xfb   :  { %503 = vst [vmem:[%s875_s3] sm:$0xff] %v575_v62  ;;  %504 = vst [vmem:[%s875_s3 + $0x8] sm:$0xff] %v576_v63  ;;  %v577_v2 = vpack.c.bf16 %v302_v0, %v300_v58  ;;  %v578_v3 = vpack.c.bf16 %v375_v1, %v373_v59 }
  0xfd   :  { %505 = vst [vmem:[%s875_s3 + $0x10] sm:$0xff] %v577_v2  ;;  %506 = vst [vmem:[%s875_s3 + $0x18] sm:$0xff] %v578_v3  ;;  %v305_v4 = vpop.f32.mrb[4].mxu0  ;;  %v378_v5 = vpop.f32.mrb[4].mxu1 }
  0xfe   :  { %v306_v6 = vadd.f32 %v305_v4, %v784_v44  ;;  %v379_v7 = vadd.f32 %v378_v5, %v786_v45  ;;  %v307_v8 = vpop.f32.mrb[5].mxu0  ;;  %v380_v9 = vpop.f32.mrb[5].mxu1 }
  0xff   :  { %v308_v10 = vadd.f32 %v307_v8, %v788_v46  ;;  %v381_v11 = vadd.f32 %v380_v9, %v790_v47  ;;  %v309_v12 = vpop.f32.mrb[6].mxu0  ;;  %v382_v13 = vpop.f32.mrb[6].mxu1 }
 0x100   :  { %v310_v14 = vadd.f32 %v309_v12, %v784_v44  ;;  %v383_v15 = vadd.f32 %v382_v13, %v786_v45  ;;  %v311_v16 = vpop.f32.mrb[7].mxu0  ;;  %v384_v17 = vpop.f32.mrb[7].mxu1 }
 0x101   :  { %v579_v18 = vpack.c.bf16 %v308_v10, %v306_v6  ;;  %v580_v19 = vpack.c.bf16 %v381_v11, %v379_v7  ;;  %v312_v20 = vadd.f32 %v311_v16, %v788_v46  ;;  %v385_v21 = vadd.f32 %v384_v17, %v790_v47 }
 0x103   :  { %507 = vst [vmem:[%s875_s3 + $0x20] sm:$0xff] %v579_v18  ;;  %508 = vst [vmem:[%s875_s3 + $0x28] sm:$0xff] %v580_v19  ;;  %v581_v22 = vpack.c.bf16 %v312_v20, %v310_v14  ;;  %v582_v23 = vpack.c.bf16 %v385_v21, %v383_v15 }
 0x105   :  { %509 = vst [vmem:[%s875_s3 + $0x30] sm:$0xff] %v581_v22  ;;  %510 = vst [vmem:[%s875_s3 + $0x38] sm:$0xff] %v582_v23  ;;  %v315_v24 = vpop.f32.mrb[8].mxu0  ;;  %v388_v25 = vpop.f32.mrb[8].mxu1 }
 0x106   :  { %v316_v26 = vadd.f32 %v315_v24, %v784_v44  ;;  %v389_v27 = vadd.f32 %v388_v25, %v786_v45  ;;  %v317_v28 = vpop.f32.mrb[9].mxu0  ;;  %v390_v29 = vpop.f32.mrb[9].mxu1 }
 0x107   :  { %v318_v30 = vadd.f32 %v317_v28, %v788_v46  ;;  %v391_v31 = vadd.f32 %v390_v29, %v790_v47  ;;  %v319_v32 = vpop.f32.mrb[10].mxu0  ;;  %v392_v33 = vpop.f32.mrb[10].mxu1 }
 0x108   :  { %v320_v34 = vadd.f32 %v319_v32, %v784_v44  ;;  %v393_v35 = vadd.f32 %v392_v33, %v786_v45  ;;  %v321_v36 = vpop.f32.mrb[11].mxu0  ;;  %v394_v37 = vpop.f32.mrb[11].mxu1 }
 0x109   :  { %v583_v38 = vpack.c.bf16 %v318_v30, %v316_v26  ;;  %v584_v39 = vpack.c.bf16 %v391_v31, %v389_v27  ;;  %v322_v40 = vadd.f32 %v321_v36, %v788_v46  ;;  %v395_v41 = vadd.f32 %v394_v37, %v790_v47 }
 0x10b   :  { %511 = vst [vmem:[%s875_s3 + $0x40] sm:$0xff] %v583_v38  ;;  %512 = vst [vmem:[%s875_s3 + $0x48] sm:$0xff] %v584_v39  ;;  %v585_v42 = vpack.c.bf16 %v322_v40, %v320_v34  ;;  %v586_v43 = vpack.c.bf16 %v395_v41, %v393_v35 }
 0x10d   :  { %513 = vst [vmem:[%s875_s3 + $0x50] sm:$0xff] %v585_v42  ;;  %514 = vst [vmem:[%s875_s3 + $0x58] sm:$0xff] %v586_v43  ;;  %v325_v48 = vpop.f32.mrb[12].mxu0  ;;  %v398_v49 = vpop.f32.mrb[12].mxu1 }
 0x10e   :  { %v326_v50 = vadd.f32 %v325_v48, %v784_v44  ;;  %v399_v51 = vadd.f32 %v398_v49, %v786_v45  ;;  %v327_v52 = vpop.f32.mrb[13].mxu0  ;;  %v400_v53 = vpop.f32.mrb[13].mxu1 }
 0x10f   :  { %v328_v54 = vadd.f32 %v327_v52, %v788_v46  ;;  %v401_v55 = vadd.f32 %v400_v53, %v790_v47  ;;  %v329_v56 = vpop.f32.mrb[14].mxu0  ;;  %v402_v57 = vpop.f32.mrb[14].mxu1 }
 0x110   :  { %v330_v58 = vadd.f32 %v329_v56, %v784_v44  ;;  %v403_v59 = vadd.f32 %v402_v57, %v786_v45  ;;  %v331_v60 = vpop.f32.mrb[15].mxu0  ;;  %v404_v61 = vpop.f32.mrb[15].mxu1 }
 0x111   :  { %v587_v62 = vpack.c.bf16 %v328_v54, %v326_v50  ;;  %v588_v63 = vpack.c.bf16 %v401_v55, %v399_v51  ;;  %v332_v0 = vadd.f32 %v331_v60, %v788_v46  ;;  %v405_v1 = vadd.f32 %v404_v61, %v790_v47 }
 0x113   :  { %515 = vst [vmem:[%s875_s3 + $0x60] sm:$0xff] %v587_v62  ;;  %516 = vst [vmem:[%s875_s3 + $0x68] sm:$0xff] %v588_v63  ;;  %v589_v2 = vpack.c.bf16 %v332_v0, %v330_v58  ;;  %v590_v44 = vpack.c.bf16 %v405_v1, %v403_v59 }
 0x115   :  { %517 = vst [vmem:[%s875_s3 + $0x70] sm:$0xff] %v589_v2  ;;  %518 = vst [vmem:[%s875_s3 + $0x78] sm:$0xff] %v590_v44 }

// kernel: lstm_lm_forward.6
= control target key start
LH: loop header
LB: loop body
LE: loop exit
PB: predicated region body
PF: predicated region fallthrough
CT: control target
= control target key end

     0   :  { %v2953_v1 = vmov 0   ;;  %s3689_s3 = inlined_call_operand.vmem [shape: bf16[128,512], index: 3, kind: input, shape index: {}]   ;;  %s3690_s1 = inlined_call_operand.vmem [shape: f32[8,128], index: 1, kind: input, shape index: {}]   ;;  %s3691_s0 = inlined_call_operand.vmem [shape: bf16[8,8,512], index: 0, kind: input, shape index: {}]   ;;  %s3692_s2 = inlined_call_operand.vmem [shape: f32[8,128], index: 2, kind: input, shape index: {}]   ;;  %s3693_s4 = inlined_call_operand.vmem [shape: bf16[8,8,128], index: 4, kind: output, shape index: {0}]   ;;  %s3694_s6 = inlined_call_operand.vmem [shape: f32[8,128], index: 6, kind: output, shape index: {2}]   ;;  %s3695_s5 = inlined_call_operand.vmem [shape: f32[8,128], index: 5, kind: output, shape index: {1}]  }
   0x1   :  { %v2992_v0 = vld [vmem:[%s3689_s3 + $0x4] ss:$16 sps:$4 sm:$0xff]   ;;  %262 = vmatprep.mubr.bf16.mxu0 %v2953_v1  ;;  %303 = vmatprep.mubr.bf16.mxu1 %v2953_v1  ;;  %v2999_v2 = vld [vmem:[%s3689_s3] ss:$16 sps:$4 sm:$0xff]   ;;  %v3011_v4 = vld [vmem:[%s3689_s3 + $0xc] ss:$16 sps:$4 sm:$0xff]  }
   0x2   :  { %230 = vmatprep.subr.bf16.mxu0 %v2992_v0  ;;  %v3005_v3 = vld [vmem:[%s3689_s3 + $0x24] ss:$16 sps:$4 sm:$0xff]   ;;  %v3016_v5 = vld [vmem:[%s3689_s3 + $0x20] ss:$16 sps:$4 sm:$0xff]   ;;  %v3021_v6 = vld [vmem:[%s3689_s3 + $0x8] ss:$16 sps:$4 sm:$0xff]   ;;  %271 = vmatprep.subr.bf16.mxu1 %v3011_v4 }
   0x3   :  { %231 = vmatpush1.bf16.msra.mxu0 %v2999_v2  ;;  %v3027_v7 = vld [vmem:[%s3689_s3 + $0x44] ss:$16 sps:$4 sm:$0xff]   ;;  %v3033_v8 = vld [vmem:[%s3689_s3 + $0x2c] ss:$16 sps:$4 sm:$0xff]   ;;  %272 = vmatpush1.bf16.msra.mxu1 %v3021_v6  ;;  %v3039_v9 = vld [vmem:[%s3689_s3 + $0x28] ss:$16 sps:$4 sm:$0xff]  }
   0x4   :  { %232 = vmatprep.subr.bf16.mxu0 %v3005_v3  ;;  %273 = vmatprep.subr.bf16.mxu1 %v3033_v8  ;;  %v3046_v10 = vld [vmem:[%s3689_s3 + $0x40] ss:$16 sps:$4 sm:$0xff]   ;;  %v3052_v11 = vld [vmem:[%s3689_s3 + $0x64] ss:$16 sps:$4 sm:$0xff]   ;;  %v3057_v12 = vld [vmem:[%s3689_s3 + $0x4c] ss:$16 sps:$4 sm:$0xff]  }
   0x5   :  { %v3063_v13 = vld [vmem:[%s3689_s3 + $0x48] ss:$16 sps:$4 sm:$0xff]   ;;  %v3070_v14 = vld [vmem:[%s3689_s3 + $0x60] ss:$16 sps:$4 sm:$0xff]   ;;  %v3075_v15 = vld [vmem:[%s3689_s3 + $0x6c] ss:$16 sps:$4 sm:$0xff]  }
   0x6   :  { %v3081_v16 = vld [vmem:[%s3689_s3 + $0x84] ss:$16 sps:$4 sm:$0xff]   ;;  %v3087_v17 = vld [vmem:[%s3689_s3 + $0x80] ss:$16 sps:$4 sm:$0xff]   ;;  %v3092_v18 = vld [vmem:[%s3689_s3 + $0x68] ss:$16 sps:$4 sm:$0xff]  }
   0x7   :  { %233 = vmatpush1.bf16.msra.mxu0 %v3016_v5  ;;  %274 = vmatpush1.bf16.msra.mxu1 %v3039_v9  ;;  %v3099_v19 = vld [vmem:[%s3689_s3 + $0x8c] ss:$16 sps:$4 sm:$0xff]   ;;  %v3105_v20 = vld [vmem:[%s3689_s3 + $0xa4] ss:$16 sps:$4 sm:$0xff]   ;;  %v3111_v21 = vld [vmem:[%s3689_s3 + $0x88] ss:$16 sps:$4 sm:$0xff]  }
   0x8   :  { %234 = vmatprep.subr.bf16.mxu0 %v3027_v7  ;;  %275 = vmatprep.subr.bf16.mxu1 %v3057_v12  ;;  %v3118_v22 = vld [vmem:[%s3689_s3 + $0xa0] ss:$16 sps:$4 sm:$0xff]   ;;  %v3123_v23 = vld [vmem:[%s3689_s3 + $0xac] ss:$16 sps:$4 sm:$0xff]   ;;  %v3129_v24 = vld [vmem:[%s3689_s3 + $0xc4] ss:$16 sps:$4 sm:$0xff]  }
   0x9   :  { %v3134_v25 = vld [vmem:[%s3689_s3 + $0xc0] ss:$16 sps:$4 sm:$0xff]   ;;  %v3139_v26 = vld [vmem:[%s3689_s3 + $0xa8] ss:$16 sps:$4 sm:$0xff]   ;;  %v3144_v27 = vld [vmem:[%s3689_s3 + $0xcc] ss:$16 sps:$4 sm:$0xff]  }
   0xa   :  { %v3150_v28 = vld [vmem:[%s3689_s3 + $0xe4] ss:$16 sps:$4 sm:$0xff]   ;;  %v3158_v29 = vld [vmem:[%s3689_s3 + $0xc8] ss:$16 sps:$4 sm:$0xff]   ;;  %v3163_v30 = vld [vmem:[%s3689_s3 + $0xe0] ss:$16 sps:$4 sm:$0xff]  }
   0xb   :  { %235 = vmatpush1.bf16.msra.mxu0 %v3046_v10  ;;  %276 = vmatpush1.bf16.msra.mxu1 %v3063_v13  ;;  %v25_v31 = vld [vmem:[%s3690_s1] sm:$0xff]  ;;  %v3171_v32 = vld [vmem:[%s3689_s3 + $0xec] ss:$16 sps:$4 sm:$0xff]   ;;  %v3180_v33 = vld [vmem:[%s3689_s3 + $0xe8] ss:$16 sps:$4 sm:$0xff]  }
   0xc   :  { %236 = vmatprep.subr.bf16.mxu0 %v3052_v11  ;;  %277 = vmatprep.subr.bf16.mxu1 %v3075_v15  ;;  %v37_v34 = vpack.c.bf16 %v25_v31, %v25_v31  ;;  %v31_v35 = vld [vmem:[%s3691_s0] sm:$0xff]  ;;  %v32_v37 = vld [vmem:[%s3691_s0 + $0x8] sm:$0xff] }
   0xd   :  { %v33_v36 = vunpack.c.l.bf16 %v31_v35  ;;  %v34_v38 = vunpack.c.h.bf16 %v31_v35  ;;  %v35_v40 = vunpack.c.l.bf16 %v32_v37  ;;  %v36_v51 = vunpack.c.h.bf16 %v32_v37  ;;  %v27_v62 = vld [vmem:[%s3692_s2] sm:$0xff] }
   0xf   :  { %237 = vmatpush1.bf16.msra.mxu0 %v3070_v14  ;;  %278 = vmatpush1.bf16.msra.mxu1 %v3092_v18 }
  0x10   :  { %238 = vmatprep.subr.bf16.mxu0 %v3081_v16  ;;  %279 = vmatprep.subr.bf16.mxu1 %v3099_v19 }
  0x13   :  { %239 = vmatpush1.bf16.msra.mxu0 %v3087_v17  ;;  %280 = vmatpush1.bf16.msra.mxu1 %v3111_v21 }
  0x14   :  { %240 = vmatprep.subr.bf16.mxu0 %v3105_v20  ;;  %281 = vmatprep.subr.bf16.mxu1 %v3123_v23 }
  0x17   :  { %241 = vmatpush1.bf16.msra.mxu0 %v3118_v22  ;;  %282 = vmatpush1.bf16.msra.mxu1 %v3139_v26 }
  0x18   :  { %242 = vmatprep.subr.bf16.mxu0 %v3129_v24  ;;  %283 = vmatprep.subr.bf16.mxu1 %v3144_v27 }
  0x1b   :  { %243 = vmatpush1.bf16.msra.mxu0 %v3134_v25  ;;  %284 = vmatpush1.bf16.msra.mxu1 %v3158_v29 }
  0x1c   :  { %244 = vmatprep.subr.bf16.mxu0 %v3150_v28  ;;  %285 = vmatprep.subr.bf16.mxu1 %v3171_v32 }
  0x1f   :  { %245 = vmatpush1.bf16.msra.mxu0 %v3163_v30  ;;  %286 = vmatpush1.bf16.msra.mxu1 %v3180_v33 }
  0x20   :  { %535 = vmatprep.subr.bf16.mxu0 %v2992_v0  ;;  %576 = vmatprep.subr.bf16.mxu1 %v3011_v4 }
  0x22   :  { %263 = vmatmul.mubr.bf16.vlgmr.msra.gmra.mrb[0].mxu0 %v37_v34  ;;  %304 = vmatmul.mubr.bf16.vlgmr.msra.gmra.mrb[0].mxu1 %v37_v34 }
  0x23   :  { %536 = vmatpush1.bf16.msra.mxu0 %v2999_v2  ;;  %567 = vmatprep.mubr.bf16.mxu0 %v2953_v1 }
  0x24   :  { %537 = vmatprep.subr.bf16.mxu0 %v3005_v3  ;;  %577 = vmatpush1.bf16.msra.mxu1 %v3021_v6 }
  0x25   :  { %608 = vmatprep.mubr.bf16.mxu1 %v2953_v1  ;;  %578 = vmatprep.subr.bf16.mxu1 %v3033_v8 }
  0x27   :  { %538 = vmatpush1.bf16.msra.mxu0 %v3016_v5 }
  0x28   :  { %539 = vmatprep.subr.bf16.mxu0 %v3027_v7  ;;  %579 = vmatpush1.bf16.msra.mxu1 %v3039_v9 }
  0x29   :  { %580 = vmatprep.subr.bf16.mxu1 %v3057_v12 }
  0x2b   :  { %540 = vmatpush1.bf16.msra.mxu0 %v3046_v10 }
  0x2c   :  { %541 = vmatprep.subr.bf16.mxu0 %v3052_v11  ;;  %581 = vmatpush1.bf16.msra.mxu1 %v3063_v13 }
  0x2d   :  { %582 = vmatprep.subr.bf16.mxu1 %v3075_v15 }
  0x2f   :  { %542 = vmatpush1.bf16.msra.mxu0 %v3070_v14 }
  0x30   :  { %543 = vmatprep.subr.bf16.mxu0 %v3081_v16  ;;  %583 = vmatpush1.bf16.msra.mxu1 %v3092_v18 }
  0x31   :  { %584 = vmatprep.subr.bf16.mxu1 %v3099_v19 }
  0x33   :  { %544 = vmatpush1.bf16.msra.mxu0 %v3087_v17 }
  0x34   :  { %545 = vmatprep.subr.bf16.mxu0 %v3105_v20  ;;  %585 = vmatpush1.bf16.msra.mxu1 %v3111_v21 }
  0x35   :  { %586 = vmatprep.subr.bf16.mxu1 %v3123_v23 }
  0x37   :  { %546 = vmatpush1.bf16.msra.mxu0 %v3118_v22 }
  0x38   :  { %547 = vmatprep.subr.bf16.mxu0 %v3129_v24  ;;  %587 = vmatpush1.bf16.msra.mxu1 %v3139_v26 }
  0x39   :  { %588 = vmatprep.subr.bf16.mxu1 %v3144_v27 }
  0x3b   :  { %548 = vmatpush1.bf16.msra.mxu0 %v3134_v25 }
  0x3c   :  { %549 = vmatprep.subr.bf16.mxu0 %v3150_v28  ;;  %589 = vmatpush1.bf16.msra.mxu1 %v3158_v29 }
  0x3d   :  { %590 = vmatprep.subr.bf16.mxu1 %v3171_v32 }
  0x3f   :  { %550 = vmatpush1.bf16.msra.mxu0 %v3163_v30 }
  0x40   :  { %841 = vmatprep.subr.bf16.mxu0 %v2992_v0  ;;  %591 = vmatpush1.bf16.msra.mxu1 %v3180_v33 }
  0x41   :  { %882 = vmatprep.subr.bf16.mxu1 %v3011_v4 }
  0xf5   :  { %v264_v39 = vpop.f32.mrb[0].mxu0  ;;  %v305_v47 = vpop.f32.mrb[0].mxu1 }
  0xf6   :  { %v312_v41 = vadd.f32 %v264_v39, %v33_v36  ;;  %v266_v42 = vpop.f32.mrb[1].mxu0  ;;  %v314_v49 = vadd.f32 %v305_v47, %v35_v40  ;;  %v307_v50 = vpop.f32.mrb[1].mxu1 }
  0xf7   :  { %v313_v43 = vadd.f32 %v266_v42, %v34_v38  ;;  %v268_v44 = vpop.f32.mrb[2].mxu0  ;;  %v309_v52 = vpop.f32.mrb[2].mxu1  ;;  %v315_v54 = vadd.f32 %v307_v50, %v36_v51  ;;  %v2531_v42 = vld [vmem:[%s3691_s0 + $0x10] sm:$0xff] }
  0xf8   :  { %v316_v45 = vmul.f32 0.5, %v312_v41  ;;  %v269_v46 = vpop.f32.mrb[3].mxu0  ;;  %v310_v53 = vpop.f32.mrb[3].mxu1  ;;  %v2532_v44 = vld [vmem:[%s3691_s0 + $0x18] sm:$0xff] }
  0xf9   :  { %v320_v48 = vmul.f32 0.5, %v313_v43  ;;  %v325_v55 = vmul.f32 0.5, %v315_v54  ;;  %v339_v43 = vunpack.c.l.bf16 %v2531_v42 }
  0xfa   :  { %2873 = vtanh.f32 %v316_v45  ;;  %v340_v45 = vunpack.c.h.bf16 %v2531_v42 }
  0xfb   :  { %2875 = vtanh.f32 %v320_v48 }
  0xfc   :  { %2877 = vtanh.f32 %v314_v49  ;;  %v341_v49 = vunpack.c.l.bf16 %v2532_v44 }
  0xfd   :  { %2879 = vtanh.f32 %v325_v55 }
 0x104   :  { %v2874_v56 = vpop.eup %2873 }
 0x105   :  { %v2876_v57 = vpop.eup %2875  ;;  %v318_v58 = vmul.f32 0.5, %v2874_v56 }
 0x106   :  { %v2878_v59 = vpop.eup %2877  ;;  %v322_v60 = vmul.f32 0.5, %v2876_v57 }
 0x107   :  { %v319_v61 = vadd.f32 0.5, %v318_v58  ;;  %v2880_v36 = vpop.eup %2879  ;;  %v342_v58 = vunpack.c.h.bf16 %v2532_v44 }
 0x108   :  { %v323_v63 = vadd.f32 0.5, %v322_v60  ;;  %v327_v37 = vmul.f32 0.5, %v2880_v36 }
 0x109   :  { %v330_v31 = vmul.f32 %v2878_v59, %v319_v61 }
 0x10a   :  { %v329_v34 = vmul.f32 %v323_v63, %v27_v62  ;;  %v328_v38 = vadd.f32 0.5, %v327_v37 }
 0x10c   :  { %v3231_v35 = vadd.f32 %v330_v31, %v329_v34 }
 0x10e   :  { %2881 = vtanh.f32 %v3231_v35 }
 0x118   :  { %v2882_v39 = vpop.eup %2881 }
 0x119   :  { %v333_v40 = vmul.f32 %v2882_v39, %v328_v38 }
 0x11b   :  { %v334_v41 = vpack.c.bf16 %v333_v40, %v333_v40 }
 0x11d   :  { %335 = vst [vmem:[%s3693_s4] sm:$0xf] %v334_v41  ;;  %568 = vmatmul.mubr.bf16.vlgmr.msra.gmra.mrb[4].mxu0 %v334_v41  ;;  %609 = vmatmul.mubr.bf16.vlgmr.msra.gmra.mrb[4].mxu1 %v334_v41 }
 0x11e   :  { %842 = vmatpush1.bf16.msra.mxu0 %v2999_v2  ;;  %883 = vmatpush1.bf16.msra.mxu1 %v3021_v6 }
 0x11f   :  { %843 = vmatprep.subr.bf16.mxu0 %v3005_v3  ;;  %884 = vmatprep.subr.bf16.mxu1 %v3033_v8 }
 0x120   :  { %873 = vmatprep.mubr.bf16.mxu0 %v2953_v1  ;;  %914 = vmatprep.mubr.bf16.mxu1 %v2953_v1 }
 0x122   :  { %844 = vmatpush1.bf16.msra.mxu0 %v3016_v5  ;;  %885 = vmatpush1.bf16.msra.mxu1 %v3039_v9 }
 0x123   :  { %845 = vmatprep.subr.bf16.mxu0 %v3027_v7  ;;  %886 = vmatprep.subr.bf16.mxu1 %v3057_v12 }
 0x126   :  { %846 = vmatpush1.bf16.msra.mxu0 %v3046_v10  ;;  %887 = vmatpush1.bf16.msra.mxu1 %v3063_v13 }
 0x127   :  { %847 = vmatprep.subr.bf16.mxu0 %v3052_v11  ;;  %888 = vmatprep.subr.bf16.mxu1 %v3075_v15 }
 0x12a   :  { %848 = vmatpush1.bf16.msra.mxu0 %v3070_v14  ;;  %889 = vmatpush1.bf16.msra.mxu1 %v3092_v18 }
 0x12b   :  { %849 = vmatprep.subr.bf16.mxu0 %v3081_v16  ;;  %890 = vmatprep.subr.bf16.mxu1 %v3099_v19 }
 0x12e   :  { %850 = vmatpush1.bf16.msra.mxu0 %v3087_v17  ;;  %891 = vmatpush1.bf16.msra.mxu1 %v3111_v21 }
 0x12f   :  { %851 = vmatprep.subr.bf16.mxu0 %v3105_v20  ;;  %892 = vmatprep.subr.bf16.mxu1 %v3123_v23 }
 0x132   :  { %852 = vmatpush1.bf16.msra.mxu0 %v3118_v22  ;;  %893 = vmatpush1.bf16.msra.mxu1 %v3139_v26 }
 0x133   :  { %853 = vmatprep.subr.bf16.mxu0 %v3129_v24  ;;  %894 = vmatprep.subr.bf16.mxu1 %v3144_v27 }
 0x136   :  { %854 = vmatpush1.bf16.msra.mxu0 %v3134_v25  ;;  %895 = vmatpush1.bf16.msra.mxu1 %v3158_v29 }
 0x137   :  { %855 = vmatprep.subr.bf16.mxu0 %v3150_v28  ;;  %896 = vmatprep.subr.bf16.mxu1 %v3171_v32 }
 0x13a   :  { %856 = vmatpush1.bf16.msra.mxu0 %v3163_v30  ;;  %897 = vmatpush1.bf16.msra.mxu1 %v3180_v33 }
 0x13b   :  { %1147 = vmatprep.subr.bf16.mxu0 %v2992_v0  ;;  %1188 = vmatprep.subr.bf16.mxu1 %v3011_v4 }
 0x1f0   :  { %v569_v46 = vpop.f32.mrb[4].mxu0  ;;  %v610_v47 = vpop.f32.mrb[4].mxu1 }
 0x1f1   :  { %v617_v48 = vadd.f32 %v569_v46, %v339_v43  ;;  %v571_v50 = vpop.f32.mrb[5].mxu0  ;;  %v612_v51 = vpop.f32.mrb[5].mxu1  ;;  %v619_v57 = vadd.f32 %v610_v47, %v341_v49 }
 0x1f2   :  { %v618_v52 = vadd.f32 %v571_v50, %v340_v45  ;;  %v573_v0 = vpop.f32.mrb[6].mxu0  ;;  %v614_v53 = vpop.f32.mrb[6].mxu1  ;;  %v620_v59 = vadd.f32 %v612_v51, %v342_v58  ;;  %v3373_v58 = vld [vmem:[%s3689_s3 + $0x28] ss:$16 sps:$4 sm:$0xff]  }
 0x1f3   :  { %v621_v4 = vmul.f32 0.5, %v617_v48  ;;  %v574_v54 = vpop.f32.mrb[7].mxu0  ;;  %v615_v55 = vpop.f32.mrb[7].mxu1  ;;  %v3334_v0 = vld [vmem:[%s3689_s3 + $0x4] ss:$16 sps:$4 sm:$0xff]  }
 0x1f4   :  { %v625_v56 = vmul.f32 0.5, %v618_v52  ;;  %v630_v60 = vmul.f32 0.5, %v620_v59  ;;  %v3339_v53 = vld [vmem:[%s3689_s3 + $0xc] ss:$16 sps:$4 sm:$0xff]   ;;  %v3349_v54 = vld [vmem:[%s3689_s3 + $0x8] ss:$16 sps:$4 sm:$0xff]  }
 0x1f5   :  { %2883 = vtanh.f32 %v621_v4  ;;  %v3344_v4 = vld [vmem:[%s3689_s3] ss:$16 sps:$4 sm:$0xff]   ;;  %v3358_v55 = vld [vmem:[%s3689_s3 + $0x24] ss:$16 sps:$4 sm:$0xff]  }
 0x1f6   :  { %2885 = vtanh.f32 %v625_v56  ;;  %v3363_v56 = vld [vmem:[%s3689_s3 + $0x2c] ss:$16 sps:$4 sm:$0xff]   ;;  %v3382_v59 = vld [vmem:[%s3689_s3 + $0x44] ss:$16 sps:$4 sm:$0xff]  }
 0x1f7   :  { %2887 = vtanh.f32 %v619_v57  ;;  %v3368_v57 = vld [vmem:[%s3689_s3 + $0x20] ss:$16 sps:$4 sm:$0xff]  }
 0x1f8   :  { %2889 = vtanh.f32 %v630_v60  ;;  %v3387_v60 = vld [vmem:[%s3689_s3 + $0x4c] ss:$16 sps:$4 sm:$0xff]  }
 0x1ff   :  { %v2884_v61 = vpop.eup %2883 }
 0x200   :  { %v2886_v62 = vpop.eup %2885  ;;  %v623_v63 = vmul.f32 0.5, %v2884_v61  ;;  %v3392_v61 = vld [vmem:[%s3689_s3 + $0x40] ss:$16 sps:$4 sm:$0xff]  }
 0x201   :  { %v627_v31 = vmul.f32 0.5, %v2886_v62  ;;  %v2888_v36 = vpop.eup %2887  ;;  %v3397_v62 = vld [vmem:[%s3689_s3 + $0x48] ss:$16 sps:$4 sm:$0xff]  }
 0x202   :  { %v624_v34 = vadd.f32 0.5, %v623_v63  ;;  %v2890_v41 = vpop.eup %2889  ;;  %v3406_v63 = vld [vmem:[%s3689_s3 + $0x64] ss:$16 sps:$4 sm:$0xff]  }
 0x203   :  { %v628_v37 = vadd.f32 0.5, %v627_v31  ;;  %v632_v42 = vmul.f32 0.5, %v2890_v41  ;;  %v3411_v31 = vld [vmem:[%s3689_s3 + $0x6c] ss:$16 sps:$4 sm:$0xff]   ;;  %v3454_v41 = vld [vmem:[%s3689_s3 + $0xa4] ss:$16 sps:$4 sm:$0xff]  }
 0x204   :  { %v635_v38 = vmul.f32 %v2888_v36, %v624_v34  ;;  %v3416_v34 = vld [vmem:[%s3689_s3 + $0x60] ss:$16 sps:$4 sm:$0xff]   ;;  %v3421_v36 = vld [vmem:[%s3689_s3 + $0x68] ss:$16 sps:$4 sm:$0xff]  }
 0x205   :  { %v634_v39 = vmul.f32 %v628_v37, %v3231_v35  ;;  %v633_v43 = vadd.f32 0.5, %v632_v42  ;;  %v3430_v37 = vld [vmem:[%s3689_s3 + $0x84] ss:$16 sps:$4 sm:$0xff]   ;;  %v3459_v42 = vld [vmem:[%s3689_s3 + $0xac] ss:$16 sps:$4 sm:$0xff]  }
 0x207   :  { %v3278_v40 = vadd.f32 %v635_v38, %v634_v39  ;;  %v3435_v38 = vld [vmem:[%s3689_s3 + $0x8c] ss:$16 sps:$4 sm:$0xff]   ;;  %v3440_v39 = vld [vmem:[%s3689_s3 + $0x80] ss:$16 sps:$4 sm:$0xff]  }
 0x209   :  { %2891 = vtanh.f32 %v3278_v40 }
 0x213   :  { %v2892_v44 = vpop.eup %2891 }
 0x214   :  { %v638_v45 = vmul.f32 %v2892_v44, %v633_v43  ;;  %v3464_v43 = vld [vmem:[%s3689_s3 + $0xa0] ss:$16 sps:$4 sm:$0xff]   ;;  %v3469_v44 = vld [vmem:[%s3689_s3 + $0xa8] ss:$16 sps:$4 sm:$0xff]  }
 0x216   :  { %v639_v46 = vpack.c.bf16 %v638_v45, %v638_v45  ;;  %v3478_v45 = vld [vmem:[%s3689_s3 + $0xc4] ss:$16 sps:$4 sm:$0xff]  }
 0x218   :  { %2565 = vst [vmem:[%s3693_s4 + $0x4] sm:$0xf] %v639_v46  ;;  %874 = vmatmul.mubr.bf16.vlgmr.msra.gmra.mrb[8].mxu0 %v639_v46  ;;  %915 = vmatmul.mubr.bf16.vlgmr.msra.gmra.mrb[8].mxu1 %v639_v46  ;;  %v3483_v46 = vld [vmem:[%s3689_s3 + $0xcc] ss:$16 sps:$4 sm:$0xff]  }
 0x219   :  { %1148 = vmatpush1.bf16.msra.mxu0 %v2999_v2  ;;  %1189 = vmatpush1.bf16.msra.mxu1 %v3021_v6  ;;  %v2566_v2 = vld [vmem:[%s3691_s0 + $0x20] sm:$0xff] }
 0x21a   :  { %1149 = vmatprep.subr.bf16.mxu0 %v3005_v3  ;;  %1190 = vmatprep.subr.bf16.mxu1 %v3033_v8  ;;  %v645_v3 = vunpack.c.l.bf16 %v2566_v2  ;;  %v646_v6 = vunpack.c.h.bf16 %v2566_v2  ;;  %v3488_v2 = vld [vmem:[%s3689_s3 + $0xc0] ss:$16 sps:$4 sm:$0xff]  }
 0x21b   :  { %1179 = vmatprep.mubr.bf16.mxu0 %v2953_v1  ;;  %1220 = vmatprep.mubr.bf16.mxu1 %v2953_v1 }
 0x21d   :  { %1150 = vmatpush1.bf16.msra.mxu0 %v3016_v5  ;;  %1191 = vmatpush1.bf16.msra.mxu1 %v3039_v9  ;;  %v2567_v5 = vld [vmem:[%s3691_s0 + $0x28] sm:$0xff] }
 0x21e   :  { %1151 = vmatprep.subr.bf16.mxu0 %v3027_v7  ;;  %1192 = vmatprep.subr.bf16.mxu1 %v3057_v12 }
 0x221   :  { %1152 = vmatpush1.bf16.msra.mxu0 %v3046_v10  ;;  %1193 = vmatpush1.bf16.msra.mxu1 %v3063_v13  ;;  %v647_v10 = vunpack.c.l.bf16 %v2567_v5 }
 0x222   :  { %1153 = vmatprep.subr.bf16.mxu0 %v3052_v11  ;;  %1194 = vmatprep.subr.bf16.mxu1 %v3075_v15 }
 0x225   :  { %1154 = vmatpush1.bf16.msra.mxu0 %v3070_v14  ;;  %1195 = vmatpush1.bf16.msra.mxu1 %v3092_v18 }
 0x226   :  { %1155 = vmatprep.subr.bf16.mxu0 %v3081_v16  ;;  %1196 = vmatprep.subr.bf16.mxu1 %v3099_v19 }
 0x229   :  { %1156 = vmatpush1.bf16.msra.mxu0 %v3087_v17  ;;  %1197 = vmatpush1.bf16.msra.mxu1 %v3111_v21  ;;  %v648_v21 = vunpack.c.h.bf16 %v2567_v5  ;;  %v3502_v5 = vld [vmem:[%s3689_s3 + $0xe4] ss:$16 sps:$4 sm:$0xff]  }
 0x22a   :  { %1157 = vmatprep.subr.bf16.mxu0 %v3105_v20  ;;  %1198 = vmatprep.subr.bf16.mxu1 %v3123_v23 }
 0x22d   :  { %1158 = vmatpush1.bf16.msra.mxu0 %v3118_v22  ;;  %1199 = vmatpush1.bf16.msra.mxu1 %v3139_v26 }
 0x22e   :  { %1159 = vmatprep.subr.bf16.mxu0 %v3129_v24  ;;  %1200 = vmatprep.subr.bf16.mxu1 %v3144_v27 }
 0x231   :  { %1160 = vmatpush1.bf16.msra.mxu0 %v3134_v25  ;;  %1201 = vmatpush1.bf16.msra.mxu1 %v3158_v29 }
 0x232   :  { %1161 = vmatprep.subr.bf16.mxu0 %v3150_v28  ;;  %1202 = vmatprep.subr.bf16.mxu1 %v3171_v32 }
 0x235   :  { %1162 = vmatpush1.bf16.msra.mxu0 %v3163_v30  ;;  %1203 = vmatpush1.bf16.msra.mxu1 %v3180_v33 }
 0x236   :  { %1453 = vmatprep.subr.bf16.mxu0 %v3334_v0  ;;  %1494 = vmatprep.subr.bf16.mxu1 %v3339_v53 }
 0x2eb   :  { %v875_v7 = vpop.f32.mrb[8].mxu0  ;;  %v916_v8 = vpop.f32.mrb[8].mxu1 }
 0x2ec   :  { %v923_v9 = vadd.f32 %v875_v7, %v645_v3  ;;  %v877_v11 = vpop.f32.mrb[9].mxu0  ;;  %v918_v12 = vpop.f32.mrb[9].mxu1  ;;  %v925_v20 = vadd.f32 %v916_v8, %v647_v10  ;;  %v3493_v3 = vld [vmem:[%s3689_s3 + $0xc8] ss:$16 sps:$4 sm:$0xff]   ;;  %v3512_v7 = vld [vmem:[%s3689_s3 + $0xe0] ss:$16 sps:$4 sm:$0xff]  }
 0x2ed   :  { %v924_v13 = vadd.f32 %v877_v11, %v646_v6  ;;  %v879_v14 = vpop.f32.mrb[10].mxu0  ;;  %v920_v15 = vpop.f32.mrb[10].mxu1  ;;  %v926_v22 = vadd.f32 %v918_v12, %v648_v21  ;;  %v3507_v6 = vld [vmem:[%s3689_s3 + $0xec] ss:$16 sps:$4 sm:$0xff]   ;;  %v3517_v8 = vld [vmem:[%s3689_s3 + $0xe8] ss:$16 sps:$4 sm:$0xff]  }
 0x2ee   :  { %v927_v16 = vmul.f32 0.5, %v923_v9  ;;  %v880_v17 = vpop.f32.mrb[11].mxu0  ;;  %v921_v18 = vpop.f32.mrb[11].mxu1  ;;  %v2601_v9 = vld [vmem:[%s3691_s0 + $0x30] sm:$0xff]  ;;  %v2602_v11 = vld [vmem:[%s3691_s0 + $0x38] sm:$0xff] }
 0x2ef   :  { %v931_v19 = vmul.f32 0.5, %v924_v13  ;;  %v936_v23 = vmul.f32 0.5, %v926_v22  ;;  %v951_v10 = vunpack.c.l.bf16 %v2601_v9  ;;  %v952_v12 = vunpack.c.h.bf16 %v2601_v9 }
 0x2f0   :  { %2893 = vtanh.f32 %v927_v16  ;;  %v953_v16 = vunpack.c.l.bf16 %v2602_v11 }
 0x2f1   :  { %2895 = vtanh.f32 %v931_v19 }
 0x2f2   :  { %2897 = vtanh.f32 %v925_v20 }
 0x2f3   :  { %2899 = vtanh.f32 %v936_v23 }
 0x2fa   :  { %v2894_v24 = vpop.eup %2893 }
 0x2fb   :  { %v2896_v25 = vpop.eup %2895  ;;  %v929_v26 = vmul.f32 0.5, %v2894_v24 }
 0x2fc   :  { %v933_v27 = vmul.f32 0.5, %v2896_v25  ;;  %v2898_v29 = vpop.eup %2897 }
 0x2fd   :  { %v930_v28 = vadd.f32 0.5, %v929_v26  ;;  %v2900_v47 = vpop.eup %2899 }
 0x2fe   :  { %v934_v30 = vadd.f32 0.5, %v933_v27  ;;  %v938_v48 = vmul.f32 0.5, %v2900_v47  ;;  %v954_v27 = vunpack.c.h.bf16 %v2602_v11 }
 0x2ff   :  { %v941_v32 = vmul.f32 %v2898_v29, %v930_v28 }
 0x300   :  { %v940_v33 = vmul.f32 %v934_v30, %v3278_v40  ;;  %v939_v49 = vadd.f32 0.5, %v938_v48  ;;  %v3445_v40 = vld [vmem:[%s3689_s3 + $0x88] ss:$16 sps:$4 sm:$0xff]  }
 0x302   :  { %v3323_v35 = vadd.f32 %v941_v32, %v940_v33 }
 0x304   :  { %2901 = vtanh.f32 %v3323_v35 }
 0x30e   :  { %v2902_v50 = vpop.eup %2901 }
 0x30f   :  { %v944_v51 = vmul.f32 %v2902_v50, %v939_v49 }
 0x311   :  { %v945_v52 = vpack.c.bf16 %v944_v51, %v944_v51 }
 0x313   :  { %2600 = vst [vmem:[%s3693_s4 + $0x8] sm:$0xf] %v945_v52  ;;  %1180 = vmatmul.mubr.bf16.vlgmr.msra.gmra.mrb[12].mxu0 %v945_v52  ;;  %1221 = vmatmul.mubr.bf16.vlgmr.msra.gmra.mrb[12].mxu1 %v945_v52 }
 0x314   :  { %1485 = vmatprep.mubr.bf16.mxu0 %v2953_v1  ;;  %1526 = vmatprep.mubr.bf16.mxu1 %v2953_v1 }
 0x315   :  { %1454 = vmatpush1.bf16.msra.mxu0 %v3344_v4  ;;  %1495 = vmatpush1.bf16.msra.mxu1 %v3349_v54 }
 0x316   :  { %1455 = vmatprep.subr.bf16.mxu0 %v3358_v55  ;;  %1496 = vmatprep.subr.bf16.mxu1 %v3363_v56 }
 0x319   :  { %1456 = vmatpush1.bf16.msra.mxu0 %v3368_v57  ;;  %1497 = vmatpush1.bf16.msra.mxu1 %v3373_v58 }
 0x31a   :  { %1457 = vmatprep.subr.bf16.mxu0 %v3382_v59  ;;  %1498 = vmatprep.subr.bf16.mxu1 %v3387_v60 }
 0x31d   :  { %1458 = vmatpush1.bf16.msra.mxu0 %v3392_v61  ;;  %1499 = vmatpush1.bf16.msra.mxu1 %v3397_v62 }
 0x31e   :  { %1459 = vmatprep.subr.bf16.mxu0 %v3406_v63  ;;  %1500 = vmatprep.subr.bf16.mxu1 %v3411_v31 }
 0x321   :  { %1460 = vmatpush1.bf16.msra.mxu0 %v3416_v34  ;;  %1501 = vmatpush1.bf16.msra.mxu1 %v3421_v36 }
 0x322   :  { %1461 = vmatprep.subr.bf16.mxu0 %v3430_v37  ;;  %1502 = vmatprep.subr.bf16.mxu1 %v3435_v38 }
 0x325   :  { %1462 = vmatpush1.bf16.msra.mxu0 %v3440_v39  ;;  %1503 = vmatpush1.bf16.msra.mxu1 %v3445_v40 }
 0x326   :  { %1463 = vmatprep.subr.bf16.mxu0 %v3454_v41  ;;  %1504 = vmatprep.subr.bf16.mxu1 %v3459_v42 }
 0x329   :  { %1464 = vmatpush1.bf16.msra.mxu0 %v3464_v43  ;;  %1505 = vmatpush1.bf16.msra.mxu1 %v3469_v44 }
 0x32a   :  { %1465 = vmatprep.subr.bf16.mxu0 %v3478_v45  ;;  %1506 = vmatprep.subr.bf16.mxu1 %v3483_v46 }
 0x32d   :  { %1466 = vmatpush1.bf16.msra.mxu0 %v3488_v2  ;;  %1507 = vmatpush1.bf16.msra.mxu1 %v3493_v3 }
 0x32e   :  { %1467 = vmatprep.subr.bf16.mxu0 %v3502_v5  ;;  %1508 = vmatprep.subr.bf16.mxu1 %v3507_v6 }
 0x331   :  { %1468 = vmatpush1.bf16.msra.mxu0 %v3512_v7  ;;  %1509 = vmatpush1.bf16.msra.mxu1 %v3517_v8 }
 0x332   :  { %1759 = vmatprep.subr.bf16.mxu0 %v3334_v0  ;;  %1800 = vmatprep.subr.bf16.mxu1 %v3339_v53 }
 0x3e6   :  { %v1181_v13 = vpop.f32.mrb[12].mxu0  ;;  %v1222_v14 = vpop.f32.mrb[12].mxu1 }
 0x3e7   :  { %v1229_v15 = vadd.f32 %v1181_v13, %v951_v10  ;;  %v1183_v17 = vpop.f32.mrb[13].mxu0  ;;  %v1224_v18 = vpop.f32.mrb[13].mxu1  ;;  %v1231_v26 = vadd.f32 %v1222_v14, %v953_v16 }
 0x3e8   :  { %v1230_v19 = vadd.f32 %v1183_v17, %v952_v12  ;;  %v1185_v20 = vpop.f32.mrb[14].mxu0  ;;  %v1226_v21 = vpop.f32.mrb[14].mxu1  ;;  %v1232_v28 = vadd.f32 %v1224_v18, %v954_v27  ;;  %v2637_v17 = vld [vmem:[%s3691_s0 + $0x48] sm:$0xff] }
 0x3e9   :  { %v1233_v22 = vmul.f32 0.5, %v1229_v15  ;;  %v1186_v23 = vpop.f32.mrb[15].mxu0  ;;  %v1227_v24 = vpop.f32.mrb[15].mxu1 }
 0x3ea   :  { %v1237_v25 = vmul.f32 0.5, %v1230_v19  ;;  %v1242_v29 = vmul.f32 0.5, %v1232_v28 }
 0x3eb   :  { %2903 = vtanh.f32 %v1233_v22  ;;  %v1259_v22 = vunpack.c.l.bf16 %v2637_v17 }
 0x3ec   :  { %2905 = vtanh.f32 %v1237_v25 }
 0x3ed   :  { %2907 = vtanh.f32 %v1231_v26 }
 0x3ee   :  { %2909 = vtanh.f32 %v1242_v29 }
 0x3f5   :  { %v2904_v30 = vpop.eup %2903 }
 0x3f6   :  { %v2906_v32 = vpop.eup %2905  ;;  %v1235_v33 = vmul.f32 0.5, %v2904_v30 }
 0x3f7   :  { %v1239_v47 = vmul.f32 0.5, %v2906_v32  ;;  %v2908_v49 = vpop.eup %2907 }
 0x3f8   :  { %v1236_v48 = vadd.f32 0.5, %v1235_v33  ;;  %v2910_v10 = vpop.eup %2909 }
 0x3f9   :  { %v1240_v50 = vadd.f32 0.5, %v1239_v47  ;;  %v1244_v11 = vmul.f32 0.5, %v2910_v10  ;;  %v1260_v47 = vunpack.c.h.bf16 %v2637_v17 }
 0x3fa   :  { %v1247_v51 = vmul.f32 %v2908_v49, %v1236_v48 }
 0x3fb   :  { %v1246_v52 = vmul.f32 %v1240_v50, %v3323_v35  ;;  %v1245_v12 = vadd.f32 0.5, %v1244_v11  ;;  %v2636_v35 = vld [vmem:[%s3691_s0 + $0x40] sm:$0xff] }
 0x3fc   :  { %v1257_v16 = vunpack.c.l.bf16 %v2636_v35  ;;  %v1258_v18 = vunpack.c.h.bf16 %v2636_v35 }
 0x3fd   :  { %v3532_v9 = vadd.f32 %v1247_v51, %v1246_v52 }
 0x3ff   :  { %2911 = vtanh.f32 %v3532_v9 }
 0x409   :  { %v2912_v13 = vpop.eup %2911 }
 0x40a   :  { %v1250_v14 = vmul.f32 %v2912_v13, %v1245_v12 }
 0x40c   :  { %v1251_v15 = vpack.c.bf16 %v1250_v14, %v1250_v14 }
 0x40e   :  { %2635 = vst [vmem:[%s3693_s4 + $0xc] sm:$0xf] %v1251_v15  ;;  %1486 = vmatmul.mubr.bf16.vlgmr.msra.gmra.mrb[16].mxu0 %v1251_v15  ;;  %1527 = vmatmul.mubr.bf16.vlgmr.msra.gmra.mrb[16].mxu1 %v1251_v15 }
 0x40f   :  { %1760 = vmatpush1.bf16.msra.mxu0 %v3344_v4  ;;  %1801 = vmatpush1.bf16.msra.mxu1 %v3349_v54 }
 0x410   :  { %1761 = vmatprep.subr.bf16.mxu0 %v3358_v55  ;;  %1802 = vmatprep.subr.bf16.mxu1 %v3363_v56 }
 0x411   :  { %1791 = vmatprep.mubr.bf16.mxu0 %v2953_v1  ;;  %1832 = vmatprep.mubr.bf16.mxu1 %v2953_v1 }
 0x413   :  { %1762 = vmatpush1.bf16.msra.mxu0 %v3368_v57  ;;  %1803 = vmatpush1.bf16.msra.mxu1 %v3373_v58 }
 0x414   :  { %1763 = vmatprep.subr.bf16.mxu0 %v3382_v59  ;;  %1804 = vmatprep.subr.bf16.mxu1 %v3387_v60 }
 0x417   :  { %1764 = vmatpush1.bf16.msra.mxu0 %v3392_v61  ;;  %1805 = vmatpush1.bf16.msra.mxu1 %v3397_v62 }
 0x418   :  { %1765 = vmatprep.subr.bf16.mxu0 %v3406_v63  ;;  %1806 = vmatprep.subr.bf16.mxu1 %v3411_v31 }
 0x41b   :  { %1766 = vmatpush1.bf16.msra.mxu0 %v3416_v34  ;;  %1807 = vmatpush1.bf16.msra.mxu1 %v3421_v36 }
 0x41c   :  { %1767 = vmatprep.subr.bf16.mxu0 %v3430_v37  ;;  %1808 = vmatprep.subr.bf16.mxu1 %v3435_v38 }
 0x41f   :  { %1768 = vmatpush1.bf16.msra.mxu0 %v3440_v39  ;;  %1809 = vmatpush1.bf16.msra.mxu1 %v3445_v40 }
 0x420   :  { %1769 = vmatprep.subr.bf16.mxu0 %v3454_v41  ;;  %1810 = vmatprep.subr.bf16.mxu1 %v3459_v42 }
 0x423   :  { %1770 = vmatpush1.bf16.msra.mxu0 %v3464_v43  ;;  %1811 = vmatpush1.bf16.msra.mxu1 %v3469_v44 }
 0x424   :  { %1771 = vmatprep.subr.bf16.mxu0 %v3478_v45  ;;  %1812 = vmatprep.subr.bf16.mxu1 %v3483_v46 }
 0x427   :  { %1772 = vmatpush1.bf16.msra.mxu0 %v3488_v2  ;;  %1813 = vmatpush1.bf16.msra.mxu1 %v3493_v3 }
 0x428   :  { %1773 = vmatprep.subr.bf16.mxu0 %v3502_v5  ;;  %1814 = vmatprep.subr.bf16.mxu1 %v3507_v6 }
 0x42b   :  { %1774 = vmatpush1.bf16.msra.mxu0 %v3512_v7  ;;  %1815 = vmatpush1.bf16.msra.mxu1 %v3517_v8 }
 0x42c   :  { %2065 = vmatprep.subr.bf16.mxu0 %v3334_v0  ;;  %2106 = vmatprep.subr.bf16.mxu1 %v3339_v53 }
 0x4e1   :  { %v1487_v19 = vpop.f32.mrb[16].mxu0  ;;  %v1528_v20 = vpop.f32.mrb[16].mxu1 }
 0x4e2   :  { %v1535_v21 = vadd.f32 %v1487_v19, %v1257_v16  ;;  %v1489_v23 = vpop.f32.mrb[17].mxu0  ;;  %v1530_v24 = vpop.f32.mrb[17].mxu1  ;;  %v1537_v33 = vadd.f32 %v1528_v20, %v1259_v22 }
 0x4e3   :  { %v1536_v25 = vadd.f32 %v1489_v23, %v1258_v18  ;;  %v1491_v26 = vpop.f32.mrb[18].mxu0  ;;  %v1532_v27 = vpop.f32.mrb[18].mxu1  ;;  %v1538_v48 = vadd.f32 %v1530_v24, %v1260_v47  ;;  %v2672_v23 = vld [vmem:[%s3691_s0 + $0x58] sm:$0xff] }
 0x4e4   :  { %v1539_v28 = vmul.f32 0.5, %v1535_v21  ;;  %v1492_v29 = vpop.f32.mrb[19].mxu0  ;;  %v1533_v30 = vpop.f32.mrb[19].mxu1 }
 0x4e5   :  { %v1543_v32 = vmul.f32 0.5, %v1536_v25  ;;  %v1548_v49 = vmul.f32 0.5, %v1538_v48 }
 0x4e6   :  { %2913 = vtanh.f32 %v1539_v28  ;;  %v1565_v28 = vunpack.c.l.bf16 %v2672_v23 }
 0x4e7   :  { %2915 = vtanh.f32 %v1543_v32 }
 0x4e8   :  { %2917 = vtanh.f32 %v1537_v33 }
 0x4e9   :  { %2919 = vtanh.f32 %v1548_v49 }
 0x4f0   :  { %v2914_v50 = vpop.eup %2913 }
 0x4f1   :  { %v2916_v51 = vpop.eup %2915  ;;  %v1541_v52 = vmul.f32 0.5, %v2914_v50 }
 0x4f2   :  { %v1545_v10 = vmul.f32 0.5, %v2916_v51  ;;  %v2918_v12 = vpop.eup %2917  ;;  %v1566_v51 = vunpack.c.h.bf16 %v2672_v23 }
 0x4f3   :  { %v1542_v11 = vadd.f32 0.5, %v1541_v52  ;;  %v2920_v16 = vpop.eup %2919 }
 0x4f4   :  { %v1546_v13 = vadd.f32 0.5, %v1545_v10  ;;  %v1550_v17 = vmul.f32 0.5, %v2920_v16 }
 0x4f5   :  { %v1553_v14 = vmul.f32 %v2918_v12, %v1542_v11 }
 0x4f6   :  { %v1552_v15 = vmul.f32 %v1546_v13, %v3532_v9  ;;  %v1551_v18 = vadd.f32 0.5, %v1550_v17  ;;  %v2671_v9 = vld [vmem:[%s3691_s0 + $0x50] sm:$0xff] }
 0x4f7   :  { %v1563_v22 = vunpack.c.l.bf16 %v2671_v9  ;;  %v1564_v24 = vunpack.c.h.bf16 %v2671_v9 }
 0x4f8   :  { %v3579_v35 = vadd.f32 %v1553_v14, %v1552_v15 }
 0x4fa   :  { %2921 = vtanh.f32 %v3579_v35 }
 0x504   :  { %v2922_v19 = vpop.eup %2921 }
 0x505   :  { %v1556_v20 = vmul.f32 %v2922_v19, %v1551_v18 }
 0x507   :  { %v1557_v21 = vpack.c.bf16 %v1556_v20, %v1556_v20 }
 0x509   :  { %2670 = vst [vmem:[%s3693_s4 + $0x10] sm:$0xf] %v1557_v21  ;;  %1792 = vmatmul.mubr.bf16.vlgmr.msra.gmra.mrb[20].mxu0 %v1557_v21  ;;  %1833 = vmatmul.mubr.bf16.vlgmr.msra.gmra.mrb[20].mxu1 %v1557_v21 }
 0x50a   :  { %2066 = vmatpush1.bf16.msra.mxu0 %v3344_v4  ;;  %2107 = vmatpush1.bf16.msra.mxu1 %v3349_v54 }
 0x50b   :  { %2067 = vmatprep.subr.bf16.mxu0 %v3358_v55  ;;  %2108 = vmatprep.subr.bf16.mxu1 %v3363_v56 }
 0x50c   :  { %2097 = vmatprep.mubr.bf16.mxu0 %v2953_v1  ;;  %2138 = vmatprep.mubr.bf16.mxu1 %v2953_v1 }
 0x50e   :  { %2068 = vmatpush1.bf16.msra.mxu0 %v3368_v57  ;;  %2109 = vmatpush1.bf16.msra.mxu1 %v3373_v58 }
 0x50f   :  { %2069 = vmatprep.subr.bf16.mxu0 %v3382_v59  ;;  %2110 = vmatprep.subr.bf16.mxu1 %v3387_v60 }
 0x512   :  { %2070 = vmatpush1.bf16.msra.mxu0 %v3392_v61  ;;  %2111 = vmatpush1.bf16.msra.mxu1 %v3397_v62 }
 0x513   :  { %2071 = vmatprep.subr.bf16.mxu0 %v3406_v63  ;;  %2112 = vmatprep.subr.bf16.mxu1 %v3411_v31 }
 0x516   :  { %2072 = vmatpush1.bf16.msra.mxu0 %v3416_v34  ;;  %2113 = vmatpush1.bf16.msra.mxu1 %v3421_v36 }
 0x517   :  { %2073 = vmatprep.subr.bf16.mxu0 %v3430_v37  ;;  %2114 = vmatprep.subr.bf16.mxu1 %v3435_v38 }
 0x51a   :  { %2074 = vmatpush1.bf16.msra.mxu0 %v3440_v39  ;;  %2115 = vmatpush1.bf16.msra.mxu1 %v3445_v40 }
 0x51b   :  { %2075 = vmatprep.subr.bf16.mxu0 %v3454_v41  ;;  %2116 = vmatprep.subr.bf16.mxu1 %v3459_v42 }
 0x51e   :  { %2076 = vmatpush1.bf16.msra.mxu0 %v3464_v43  ;;  %2117 = vmatpush1.bf16.msra.mxu1 %v3469_v44 }
 0x51f   :  { %2077 = vmatprep.subr.bf16.mxu0 %v3478_v45  ;;  %2118 = vmatprep.subr.bf16.mxu1 %v3483_v46 }
 0x522   :  { %2078 = vmatpush1.bf16.msra.mxu0 %v3488_v2  ;;  %2119 = vmatpush1.bf16.msra.mxu1 %v3493_v3 }
 0x523   :  { %2079 = vmatprep.subr.bf16.mxu0 %v3502_v5  ;;  %2120 = vmatprep.subr.bf16.mxu1 %v3507_v6 }
 0x526   :  { %2080 = vmatpush1.bf16.msra.mxu0 %v3512_v7  ;;  %2121 = vmatpush1.bf16.msra.mxu1 %v3517_v8 }
 0x527   :  { %2371 = vmatprep.subr.bf16.mxu0 %v3334_v0  ;;  %2412 = vmatprep.subr.bf16.mxu1 %v3339_v53 }
 0x5dc   :  { %v1793_v25 = vpop.f32.mrb[20].mxu0  ;;  %v1834_v26 = vpop.f32.mrb[20].mxu1 }
 0x5dd   :  { %v1841_v27 = vadd.f32 %v1793_v25, %v1563_v22  ;;  %v1795_v29 = vpop.f32.mrb[21].mxu0  ;;  %v1836_v30 = vpop.f32.mrb[21].mxu1  ;;  %v1843_v50 = vadd.f32 %v1834_v26, %v1565_v28 }
 0x5de   :  { %v1842_v32 = vadd.f32 %v1795_v29, %v1564_v24  ;;  %v1797_v0 = vpop.f32.mrb[22].mxu0  ;;  %v1838_v33 = vpop.f32.mrb[22].mxu1  ;;  %v1844_v52 = vadd.f32 %v1836_v30, %v1566_v51 }
 0x5df   :  { %v1845_v53 = vmul.f32 0.5, %v1841_v27  ;;  %v1798_v47 = vpop.f32.mrb[23].mxu0  ;;  %v1839_v48 = vpop.f32.mrb[23].mxu1  ;;  %v2742_v33 = vld [vmem:[%s3691_s0 + $0x78] sm:$0xff] }
 0x5e0   :  { %v1849_v49 = vmul.f32 0.5, %v1842_v32  ;;  %v1854_v10 = vmul.f32 0.5, %v1844_v52  ;;  %v2741_v32 = vld [vmem:[%s3691_s0 + $0x70] sm:$0xff] }
 0x5e1   :  { %2923 = vtanh.f32 %v1845_v53  ;;  %v2175_v0 = vunpack.c.l.bf16 %v2741_v32  ;;  %v2176_v53 = vunpack.c.h.bf16 %v2741_v32 }
 0x5e2   :  { %2925 = vtanh.f32 %v1849_v49 }
 0x5e3   :  { %2927 = vtanh.f32 %v1843_v50  ;;  %v2177_v50 = vunpack.c.l.bf16 %v2742_v33 }
 0x5e4   :  { %2929 = vtanh.f32 %v1854_v10 }
 0x5eb   :  { %v2924_v11 = vpop.eup %2923 }
 0x5ec   :  { %v2926_v12 = vpop.eup %2925  ;;  %v1847_v13 = vmul.f32 0.5, %v2924_v11 }
 0x5ed   :  { %v1851_v14 = vmul.f32 0.5, %v2926_v12  ;;  %v2928_v16 = vpop.eup %2927 }
 0x5ee   :  { %v1848_v15 = vadd.f32 0.5, %v1847_v13  ;;  %v2930_v21 = vpop.eup %2929 }
 0x5ef   :  { %v1852_v17 = vadd.f32 0.5, %v1851_v14  ;;  %v1856_v9 = vmul.f32 0.5, %v2930_v21 }
 0x5f0   :  { %v1859_v18 = vmul.f32 %v2928_v16, %v1848_v15 }
 0x5f1   :  { %v1858_v19 = vmul.f32 %v1852_v17, %v3579_v35  ;;  %v1857_v22 = vadd.f32 0.5, %v1856_v9 }
 0x5f3   :  { %v3626_v20 = vadd.f32 %v1859_v18, %v1858_v19  ;;  %v2178_v18 = vunpack.c.h.bf16 %v2742_v33 }
 0x5f5   :  { %2931 = vtanh.f32 %v3626_v20 }
 0x5ff   :  { %v2932_v23 = vpop.eup %2931 }
 0x600   :  { %v1862_v24 = vmul.f32 %v2932_v23, %v1857_v22 }
 0x602   :  { %v1863_v25 = vpack.c.bf16 %v1862_v24, %v1862_v24 }
 0x604   :  { %2705 = vst [vmem:[%s3693_s4 + $0x14] sm:$0xf] %v1863_v25  ;;  %2098 = vmatmul.mubr.bf16.vlgmr.msra.gmra.mrb[24].mxu0 %v1863_v25  ;;  %2139 = vmatmul.mubr.bf16.vlgmr.msra.gmra.mrb[24].mxu1 %v1863_v25 }
 0x605   :  { %2372 = vmatpush1.bf16.msra.mxu0 %v3344_v4  ;;  %2413 = vmatpush1.bf16.msra.mxu1 %v3349_v54  ;;  %v2707_v54 = vld [vmem:[%s3691_s0 + $0x68] sm:$0xff] }
 0x606   :  { %2373 = vmatprep.subr.bf16.mxu0 %v3358_v55  ;;  %2414 = vmatprep.subr.bf16.mxu1 %v3363_v56 }
 0x607   :  { %2403 = vmatprep.mubr.bf16.mxu0 %v2953_v1  ;;  %2444 = vmatprep.mubr.bf16.mxu1 %v2953_v1  ;;  %v2706_v1 = vld [vmem:[%s3691_s0 + $0x60] sm:$0xff] }
 0x608   :  { %v1869_v4 = vunpack.c.l.bf16 %v2706_v1  ;;  %v1870_v55 = vunpack.c.h.bf16 %v2706_v1 }
 0x609   :  { %2374 = vmatpush1.bf16.msra.mxu0 %v3368_v57  ;;  %2415 = vmatpush1.bf16.msra.mxu1 %v3373_v58 }
 0x60a   :  { %2375 = vmatprep.subr.bf16.mxu0 %v3382_v59  ;;  %2416 = vmatprep.subr.bf16.mxu1 %v3387_v60  ;;  %v1871_v59 = vunpack.c.l.bf16 %v2707_v54 }
 0x60d   :  { %2376 = vmatpush1.bf16.msra.mxu0 %v3392_v61  ;;  %2417 = vmatpush1.bf16.msra.mxu1 %v3397_v62 }
 0x60e   :  { %2377 = vmatprep.subr.bf16.mxu0 %v3406_v63  ;;  %2418 = vmatprep.subr.bf16.mxu1 %v3411_v31 }
 0x611   :  { %2378 = vmatpush1.bf16.msra.mxu0 %v3416_v34  ;;  %2419 = vmatpush1.bf16.msra.mxu1 %v3421_v36 }
 0x612   :  { %2379 = vmatprep.subr.bf16.mxu0 %v3430_v37  ;;  %2420 = vmatprep.subr.bf16.mxu1 %v3435_v38 }
 0x615   :  { %2380 = vmatpush1.bf16.msra.mxu0 %v3440_v39  ;;  %2421 = vmatpush1.bf16.msra.mxu1 %v3445_v40  ;;  %v1872_v40 = vunpack.c.h.bf16 %v2707_v54 }
 0x616   :  { %2381 = vmatprep.subr.bf16.mxu0 %v3454_v41  ;;  %2422 = vmatprep.subr.bf16.mxu1 %v3459_v42 }
 0x619   :  { %2382 = vmatpush1.bf16.msra.mxu0 %v3464_v43  ;;  %2423 = vmatpush1.bf16.msra.mxu1 %v3469_v44 }
 0x61a   :  { %2383 = vmatprep.subr.bf16.mxu0 %v3478_v45  ;;  %2424 = vmatprep.subr.bf16.mxu1 %v3483_v46 }
 0x61d   :  { %2384 = vmatpush1.bf16.msra.mxu0 %v3488_v2  ;;  %2425 = vmatpush1.bf16.msra.mxu1 %v3493_v3 }
 0x61e   :  { %2385 = vmatprep.subr.bf16.mxu0 %v3502_v5  ;;  %2426 = vmatprep.subr.bf16.mxu1 %v3507_v6 }
 0x621   :  { %2386 = vmatpush1.bf16.msra.mxu0 %v3512_v7  ;;  %2427 = vmatpush1.bf16.msra.mxu1 %v3517_v8 }
 0x6d7   :  { %v2099_v56 = vpop.f32.mrb[24].mxu0  ;;  %v2140_v57 = vpop.f32.mrb[24].mxu1 }
 0x6d8   :  { %v2147_v58 = vadd.f32 %v2099_v56, %v1869_v4  ;;  %v2101_v60 = vpop.f32.mrb[25].mxu0  ;;  %v2142_v61 = vpop.f32.mrb[25].mxu1  ;;  %v2149_v39 = vadd.f32 %v2140_v57, %v1871_v59 }
 0x6d9   :  { %v2148_v62 = vadd.f32 %v2101_v60, %v1870_v55  ;;  %v2103_v63 = vpop.f32.mrb[26].mxu0  ;;  %v2144_v31 = vpop.f32.mrb[26].mxu1  ;;  %v2150_v41 = vadd.f32 %v2142_v61, %v1872_v40 }
 0x6da   :  { %v2151_v34 = vmul.f32 0.5, %v2147_v58  ;;  %v2104_v36 = vpop.f32.mrb[27].mxu0  ;;  %v2145_v37 = vpop.f32.mrb[27].mxu1 }
 0x6db   :  { %v2155_v38 = vmul.f32 0.5, %v2148_v62  ;;  %v2160_v42 = vmul.f32 0.5, %v2150_v41 }
 0x6dc   :  { %2933 = vtanh.f32 %v2151_v34 }
 0x6dd   :  { %2935 = vtanh.f32 %v2155_v38 }
 0x6de   :  { %2937 = vtanh.f32 %v2149_v39 }
 0x6df   :  { %2939 = vtanh.f32 %v2160_v42 }
 0x6e6   :  { %v2934_v43 = vpop.eup %2933 }
 0x6e7   :  { %v2936_v44 = vpop.eup %2935  ;;  %v2153_v45 = vmul.f32 0.5, %v2934_v43 }
 0x6e8   :  { %v2157_v46 = vmul.f32 0.5, %v2936_v44  ;;  %v2938_v3 = vpop.eup %2937 }
 0x6e9   :  { %v2154_v2 = vadd.f32 0.5, %v2153_v45  ;;  %v2940_v35 = vpop.eup %2939 }
 0x6ea   :  { %v2158_v5 = vadd.f32 0.5, %v2157_v46  ;;  %v2162_v26 = vmul.f32 0.5, %v2940_v35 }
 0x6eb   :  { %v2165_v6 = vmul.f32 %v2938_v3, %v2154_v2 }
 0x6ec   :  { %v2164_v7 = vmul.f32 %v2158_v5, %v3626_v20  ;;  %v2163_v27 = vadd.f32 0.5, %v2162_v26 }
 0x6ee   :  { %v2166_v8 = vadd.f32 %v2165_v6, %v2164_v7 }
 0x6f0   :  { %2941 = vtanh.f32 %v2166_v8 }
 0x6fa   :  { %v2942_v28 = vpop.eup %2941 }
 0x6fb   :  { %v2168_v29 = vmul.f32 %v2942_v28, %v2163_v27 }
 0x6fd   :  { %v2169_v30 = vpack.c.bf16 %v2168_v29, %v2168_v29 }
 0x6ff   :  { %2740 = vst [vmem:[%s3693_s4 + $0x18] sm:$0xf] %v2169_v30  ;;  %2404 = vmatmul.mubr.bf16.vlgmr.msra.gmra.mrb[28].mxu0 %v2169_v30  ;;  %2445 = vmatmul.mubr.bf16.vlgmr.msra.gmra.mrb[28].mxu1 %v2169_v30 }
 0x7d2   :  { %v2405_v47 = vpop.f32.mrb[28].mxu0  ;;  %v2446_v48 = vpop.f32.mrb[28].mxu1 }
 0x7d3   :  { %v2453_v49 = vadd.f32 %v2405_v47, %v2175_v0  ;;  %v2407_v51 = vpop.f32.mrb[29].mxu0  ;;  %v2448_v52 = vpop.f32.mrb[29].mxu1  ;;  %v2455_v17 = vadd.f32 %v2446_v48, %v2177_v50 }
 0x7d4   :  { %v2454_v10 = vadd.f32 %v2407_v51, %v2176_v53  ;;  %v2409_v11 = vpop.f32.mrb[30].mxu0  ;;  %v2450_v12 = vpop.f32.mrb[30].mxu1  ;;  %v2456_v19 = vadd.f32 %v2448_v52, %v2178_v18 }
 0x7d5   :  { %v2457_v13 = vmul.f32 0.5, %v2453_v49  ;;  %v2410_v14 = vpop.f32.mrb[31].mxu0  ;;  %v2451_v15 = vpop.f32.mrb[31].mxu1 }
 0x7d6   :  { %v2461_v16 = vmul.f32 0.5, %v2454_v10  ;;  %v2466_v20 = vmul.f32 0.5, %v2456_v19 }
 0x7d7   :  { %2943 = vtanh.f32 %v2457_v13 }
 0x7d8   :  { %2945 = vtanh.f32 %v2461_v16 }
 0x7d9   :  { %2947 = vtanh.f32 %v2455_v17 }
 0x7da   :  { %2949 = vtanh.f32 %v2466_v20 }
 0x7e1   :  { %v2944_v21 = vpop.eup %2943 }
 0x7e2   :  { %v2946_v9 = vpop.eup %2945  ;;  %v2459_v22 = vmul.f32 0.5, %v2944_v21 }
 0x7e3   :  { %v2463_v23 = vmul.f32 0.5, %v2946_v9  ;;  %v2948_v25 = vpop.eup %2947 }
 0x7e4   :  { %v2460_v24 = vadd.f32 0.5, %v2459_v22  ;;  %v2950_v56 = vpop.eup %2949 }
 0x7e5   :  { %v2464_v1 = vadd.f32 0.5, %v2463_v23  ;;  %v2468_v57 = vmul.f32 0.5, %v2950_v56 }
 0x7e6   :  { %v2471_v4 = vmul.f32 %v2948_v25, %v2460_v24 }
 0x7e7   :  { %v2470_v54 = vmul.f32 %v2464_v1, %v2166_v8  ;;  %v2469_v58 = vadd.f32 0.5, %v2468_v57 }
 0x7e9   :  { %v2472_v55 = vadd.f32 %v2471_v4, %v2470_v54 }
 0x7eb   :  { %2951 = vtanh.f32 %v2472_v55  ;;  %2486 = vst [vmem:[%s3694_s6] sm:$0xff] %v2472_v55 }
 0x7f5   :  { %v2952_v59 = vpop.eup %2951 }
 0x7f6   :  { %v2474_v60 = vmul.f32 %v2952_v59, %v2469_v58 }
 0x7f8   :  { %v2475_v61 = vpack.c.bf16 %v2474_v60, %v2474_v60  ;;  %2484 = vst [vmem:[%s3695_s5] sm:$0xff] %v2474_v60 }
 0x7fa   :  { %2775 = vst [vmem:[%s3693_s4 + $0x1c] sm:$0xf] %v2475_v61 }

</bundles_post_ra>
